<compile_context>
chip_gen: v7x
topology: tpu7x:2x2x1
jax: 0.10.0
libtpu: 0.0.40
codegen_flags: <defaults>
</compile_context>

<pallas_src>
import functools

import jax
import jax.numpy as jnp
from jax import lax
from jax.experimental import pallas as pl
from jax.experimental.pallas import tpu as pltpu


# ------------------------------ small helpers --------------------------------
def _round_up(n, m):
    return ((n + m - 1) // m) * m


def _gru_vmem_footprint(tc, bb, H):
    """Rough per-grid-step VMEM bytes for the recurrence kernel (f32)."""
    f32 = 4
    x_tile = tc * bb * H * f32            # input tile (double buffered)
    out_tile = tc * bb * H * f32          # output tile (double buffered)
    xp = tc * bb * 3 * H * f32            # in-kernel chunk projection
    weights = 2 * (H * 3 * H) * f32       # w_i + w_h (pipelined copies)
    misc = (4 * H) * f32 + bb * H * f32   # biases + h scratch
    return 2 * x_tile + 2 * out_tile + xp + 2 * weights + misc


# ------------------------ row-tiled linear (x @ W + b) ------------------------
def _linear_rows_kernel(x_ref, w_ref, b_ref, o_ref):
    o_ref[...] = (jnp.dot(x_ref[...], w_ref[...],
                          preferred_element_type=jnp.float32) + b_ref[...])


def linear_rows_pallas(x, w, b, *, max_block_rows=512):
    """x: (N, K) f32, w: (K, M) f32, b: (1, M) f32 -> (N, M) f32.

    Used only for the (lane-dense, padded) output layer.  Rows are padded to a
    multiple of 8 so tiling never degenerates to a single untiled block.
    """
    N, K = x.shape
    M = w.shape[1]
    Np = _round_up(max(N, 8), 8)
    if Np != N:
        x = jnp.pad(x, ((0, Np - N), (0, 0)))

    br = Np
    for cand in range(min(Np, max_block_rows), 7, -1):
        if Np % cand == 0 and cand % 8 == 0:
            br = cand
            break

    out = pl.pallas_call(
        _linear_rows_kernel,
        out_shape=jax.ShapeDtypeStruct((Np, M), jnp.float32),
        grid=(Np // br,),
        in_specs=[pl.BlockSpec((br, K), lambda i: (i, 0)),
                  pl.BlockSpec((K, M), lambda i: (0, 0)),
                  pl.BlockSpec((1, M), lambda i: (0, 0))],
        out_specs=pl.BlockSpec((br, M), lambda i: (i, 0)),
        compiler_params=pltpu.CompilerParams(dimension_semantics=("parallel",)),
    )(x, w, b)
    return out[:N]


# --------------------- fused GRU layer (projection + recurrence) ---------------
def _gru_layer_kernel(x_ref, w_i_ref, w_h_ref, b_i_ref, b_hn_ref, out_ref,
                      h_scratch, *, tc, bb, hidden):
    """One grid step == one (batch block, time chunk).  Time axis is innermost.

    x_ref:    (tc, bb, H)  layer input for this chunk
    w_i_ref:  (H, 3H)      fused input weights  [W_ir^T | W_iz^T | W_in^T] (padded)
    w_h_ref:  (H, 3H)      fused recurrent weights
    b_i_ref:  (1, 3H)      merged biases [b_ir+b_hr | b_iz+b_hz | b_in]
    b_hn_ref: (1, H)       candidate recurrent bias (must stay inside r*(...))
    h_scratch:(bb, H)      hidden state, persists across the time grid axis
    """
    H = hidden

    @pl.when(pl.program_id(1) == 0)          # new batch block -> reset hidden state
    def _():
        h_scratch[...] = jnp.zeros_like(h_scratch)

    w_i = w_i_ref[...]                        # constant block index -> VMEM resident
    w_h = w_h_ref[...]
    b_hn = jnp.broadcast_to(b_hn_ref[...], (bb, H))   # hoisted out of the step loop

    # Fused, hoisted input projection: one big MXU matmul for the whole chunk
    # (no (T,B,3H) HBM round-trip).
    x_flat = x_ref[...].reshape(tc * bb, H)
    xp = (jnp.dot(x_flat, w_i, preferred_element_type=jnp.float32)
          + b_i_ref[...]).reshape(tc, bb, 3 * H)

    # Fully unrolled timestep loop: static slices / static stores.
    h = h_scratch[...]
    for t in range(tc):
        xpt = xp[t]                                                     # (bb, 3H)
        hg = jnp.dot(h, w_h, preferred_element_type=jnp.float32)        # (bb, 3H)
        r = jax.nn.sigmoid(xpt[:, :H] + hg[:, :H])
        z = jax.nn.sigmoid(xpt[:, H:2 * H] + hg[:, H:2 * H])
        n = jnp.tanh(xpt[:, 2 * H:] + r * (hg[:, 2 * H:] + b_hn))
        h = (1.0 - z) * n + z * h
        out_ref[t] = h
    h_scratch[...] = h


def gru_layer_pallas(x_tbh, w_i, w_h, b_i, b_hn, *, time_chunk=8,
                     batch_block=256, vmem_budget_bytes=None):
    """x_tbh: (T, B, H) f32 time-major -> (T, B, H) hidden states for this layer.

    H must be a multiple of 128 (lane-aligned gate slices / unmasked stores).
    """
    T, B, H = x_tbh.shape
    assert H % 128 == 0, "hidden dim must be lane-padded to a multiple of 128"

    # Batch block: full B when small / indivisible, otherwise a multiple of 8.
    if B <= 8 or B % 8 != 0:
        bb = B
    else:
        bb = B
        for cand in range(min(B, batch_block), 7, -1):
            if B % cand == 0 and cand % 8 == 0:
                bb = cand
                break

    # Time chunk sized against a conservative VMEM budget (v7x has only 64 MiB
    # physical per TC; keep well under the scoped default).
    budget = vmem_budget_bytes if vmem_budget_bytes is not None else (24 << 20)
    tc = max(1, min(time_chunk, T))
    while tc > 1 and _gru_vmem_footprint(tc, bb, H) > budget:
        tc //= 2

    Tp = _round_up(T, tc)
    if Tp != T:
        x_tbh = jnp.pad(x_tbh, ((0, Tp - T), (0, 0), (0, 0)))

    vmem_limit = int(min(64 << 20,
                         max(32 << 20, 1.5 * _gru_vmem_footprint(tc, bb, H))))

    kernel = functools.partial(_gru_layer_kernel, tc=tc, bb=bb, hidden=H)
    out = pl.pallas_call(
        kernel,
        out_shape=jax.ShapeDtypeStruct((Tp, B, H), jnp.float32),
        grid=(B // bb, Tp // tc),                       # (batch blocks, time chunks)
        in_specs=[
            pl.BlockSpec((tc, bb, H), lambda b, c: (c, b, 0)),
            pl.BlockSpec((H, 3 * H), lambda b, c: (0, 0)),
            pl.BlockSpec((H, 3 * H), lambda b, c: (0, 0)),
            pl.BlockSpec((1, 3 * H), lambda b, c: (0, 0)),
            pl.BlockSpec((1, H), lambda b, c: (0, 0)),
        ],
        out_specs=pl.BlockSpec((tc, bb, H), lambda b, c: (c, b, 0)),
        scratch_shapes=[pltpu.VMEM((bb, H), jnp.float32)],
        compiler_params=pltpu.CompilerParams(
            dimension_semantics=("parallel", "arbitrary"),   # time MUST stay arbitrary
            vmem_limit_bytes=vmem_limit),
    )(x_tbh, w_i, w_h, b_i, b_hn)
    return out[:T]


# ------------------------------- parameters ----------------------------------
def init_params(key, vocab_size, hidden_size, output_size, num_layers):
    """Deterministic init matching the PyTorch module's parameter shapes.

    Kernel-side copies are pre-fused and zero-padded (gate-blocked) to a
    lane-aligned hidden width Hp = round_up(H, 128).  Padding is an exact
    algebraic no-op: padded lanes of the hidden state stay exactly zero.
    """
    H = hidden_size
    Hp = _round_up(max(H, 128), 128)
    k = 1.0 / jnp.sqrt(jnp.float32(H))
    keys = jax.random.split(key, 2 + 4 * num_layers)

    # nn.Embedding(input_size, hidden_size): N(0, 1)
    embedding = jax.random.normal(keys[0], (vocab_size, H), jnp.float32)
    embedding_pad = jnp.zeros((vocab_size, Hp), jnp.float32).at[:, :H].set(embedding)

    gru_layers = []
    for layer in range(num_layers):
        kw_ih, kw_hh, kb_ih, kb_hh = keys[2 + 4 * layer: 2 + 4 * layer + 4]
        w_ih = jax.random.uniform(kw_ih, (3 * H, H), jnp.float32, -k, k)   # rows [r; z; n]
        w_hh = jax.random.uniform(kw_hh, (3 * H, H), jnp.float32, -k, k)
        b_ih = jax.random.uniform(kb_ih, (3 * H,), jnp.float32, -k, k)
        b_hh = jax.random.uniform(kb_hh, (3 * H,), jnp.float32, -k, k)

        w_i = w_ih.T                                    # (H, 3H) columns [r|z|n]
        w_h = w_hh.T                                    # (H, 3H) columns [r|z|n]
        # Merged biases: r,z gates take b_i* + b_h*; candidate keeps b_in only
        # (b_hn must stay separate because of r * (W_hn h + b_hn)).
        b_i = jnp.concatenate([b_ih[:H] + b_hh[:H],
                               b_ih[H:2 * H] + b_hh[H:2 * H],
                               b_ih[2 * H:]])
        b_hn = b_hh[2 * H:]

        # Gate-blocked zero padding to lane-aligned width Hp.
        w_i_pad = jnp.zeros((Hp, 3 * Hp), jnp.float32)
        w_h_pad = jnp.zeros((Hp, 3 * Hp), jnp.float32)
        b_i_pad = jnp.zeros((1, 3 * Hp), jnp.float32)
        for g in range(3):
            w_i_pad = w_i_pad.at[:H, g * Hp:g * Hp + H].set(w_i[:, g * H:(g + 1) * H])
            w_h_pad = w_h_pad.at[:H, g * Hp:g * Hp + H].set(w_h[:, g * H:(g + 1) * H])
            b_i_pad = b_i_pad.at[0, g * Hp:g * Hp + H].set(b_i[g * H:(g + 1) * H])
        b_hn_pad = jnp.zeros((1, Hp), jnp.float32).at[0, :H].set(b_hn)

        gru_layers.append({
            "w_i": w_i, "w_h": w_h,
            "b_i": b_i.reshape(1, 3 * H), "b_hn": b_hn.reshape(1, H),
            "w_i_pad": w_i_pad, "w_h_pad": w_h_pad,
            "b_i_pad": b_i_pad, "b_hn_pad": b_hn_pad,
        })

    # nn.Linear(hidden_size, output_size) — zero-padded to a lane-dense width.
    kw, kb = jax.random.split(keys[1])
    w_out = jax.random.uniform(kw, (H, output_size), jnp.float32, -k, k)
    b_out = jax.random.uniform(kb, (1, output_size), jnp.float32, -k, k)
    o_pad = _round_up(max(output_size, 128), 128)
    w_out_pad = jnp.zeros((Hp, o_pad), jnp.float32).at[:H, :output_size].set(w_out)
    b_out_pad = jnp.zeros((1, o_pad), jnp.float32).at[:, :output_size].set(b_out)

    return {"embedding": embedding, "embedding_pad": embedding_pad,
            "gru_layers": gru_layers,
            "w_out": w_out, "b_out": b_out,
            "w_out_pad": w_out_pad, "b_out_pad": b_out_pad,
            "hidden_size": H, "hidden_size_pad": Hp,
            "output_size": output_size}


# ------------------------------- forward pass ---------------------------------
def gru_network_forward(params, tokens):
    """tokens: (B, T) int32 -> logits (B, T, output_size)."""
    # Gather directly into time-major layout (T, B, Hp): only the tiny int token
    # matrix is transposed, the full activation never round-trips HBM for layout.
    x = jnp.take(params["embedding_pad"], tokens.T, axis=0)               # (T, B, Hp)
    for lp in params["gru_layers"]:
        x = gru_layer_pallas(x, lp["w_i_pad"], lp["w_h_pad"],
                             lp["b_i_pad"], lp["b_hn_pad"])
    T, B, Hp = x.shape

    # Lane-dense (padded) output projection, row-tiled; slice + transpose the
    # small logits tensor back to batch-first.
    logits_pad = linear_rows_pallas(x.reshape(T * B, Hp),
                                    params["w_out_pad"], params["b_out_pad"])
    O = params["output_size"]
    logits = logits_pad.reshape(T, B, -1)[:, :, :O]
    return jnp.transpose(logits, (1, 0, 2))                               # (B, T, O)


# ---------------------------- pure-JAX reference -------------------------------
def gru_network_ref(params, tokens):
    H = params["hidden_size"]
    x = jnp.take(params["embedding"], tokens, axis=0).astype(jnp.float32)  # (B, T, H)
    B, T, _ = x.shape
    for lp in params["gru_layers"]:
        w_i, w_h, b_i, b_hn = lp["w_i"], lp["w_h"], lp["b_i"], lp["b_hn"]

        def step(h, x_t):
            xp = x_t @ w_i + b_i
            hg = h @ w_h
            r = jax.nn.sigmoid(xp[:, :H] + hg[:, :H])
            z = jax.nn.sigmoid(xp[:, H:2 * H] + hg[:, H:2 * H])
            n = jnp.tanh(xp[:, 2 * H:] + r * (hg[:, 2 * H:] + b_hn))
            h_new = (1.0 - z) * n + z * h
            return h_new, h_new

        h0 = jnp.zeros((B, H), jnp.float32)
        _, ys = lax.scan(step, h0, jnp.transpose(x, (1, 0, 2)))
        x = jnp.transpose(ys, (1, 0, 2))
    return x @ params["w_out"] + params["b_out"]


if __name__ == "__main__":
    vocab_size, hidden_size, output_size, num_layers = 16, 32, 10, 2
    batch, seq_len = 2, 8

    key = jax.random.PRNGKey(0)
    kp, kt = jax.random.split(key)
    params = init_params(kp, vocab_size, hidden_size, output_size, num_layers)
    tokens = jax.random.randint(kt, (batch, seq_len), 0, vocab_size, dtype=jnp.int32)

    out = gru_network_forward(params, tokens)
    out = jax.block_until_ready(out)

    ref = gru_network_ref(params, tokens)
    assert out.shape == (batch, seq_len, output_size), out.shape
    max_err = float(jnp.max(jnp.abs(out - ref)))
    assert jnp.allclose(out, ref, atol=1e-4, rtol=1e-4), f"max_err={max_err}"

    print("KERNEL_OK")
</pallas_src>

<mosaic_0001>
module attributes {stable_mosaic.version = 11 : i64} {
  func.func @_gru_layer_kernel(%arg0: i32, %arg1: i32, %arg2: memref<8x2x128xf32, #tpu.memory_space<vmem>>, %arg3: memref<128x384xf32, #tpu.memory_space<vmem>>, %arg4: memref<128x384xf32, #tpu.memory_space<vmem>>, %arg5: memref<1x384xf32, #tpu.memory_space<vmem>>, %arg6: memref<1x128xf32, #tpu.memory_space<vmem>>, %arg7: memref<8x2x128xf32, #tpu.memory_space<vmem>>, %arg8: memref<2x128xf32, #tpu.memory_space<vmem>>) attributes {dimension_semantics = [#tpu.dimension_semantics<parallel>, #tpu.dimension_semantics<arbitrary>], iteration_bounds = array<i64: 1, 1>, scalar_prefetch = 0 : i64, scratch_operands = 1 : i64, tpu.core_type = #tpu.core_type<tc>, window_params = [{transform_indices = @transform_0, window_bounds = array<i64: 8, 2, 128>}, {pipeline_mode = #tpu.pipeline_mode<synchronous>, transform_indices = @transform_1, window_bounds = array<i64: 128, 384>}, {pipeline_mode = #tpu.pipeline_mode<synchronous>, transform_indices = @transform_2, window_bounds = array<i64: 128, 384>}, {pipeline_mode = #tpu.pipeline_mode<synchronous>, transform_indices = @transform_3, window_bounds = array<i64: 1, 384>}, {pipeline_mode = #tpu.pipeline_mode<synchronous>, transform_indices = @transform_4, window_bounds = array<i64: 1, 128>}, {transform_indices = @transform_5, window_bounds = array<i64: 8, 2, 128>}]} {
    %c0_i32 = arith.constant 0 : i32
    %0 = arith.cmpi eq, %arg1, %c0_i32 : i32
    %1 = arith.extui %0 : i1 to i32
    %c0_i32_0 = arith.constant 0 : i32
    %2 = arith.cmpi ne, %1, %c0_i32_0 : i32
    scf.if %2 {
      %cst_64 = arith.constant 0.000000e+00 : f32
      %281 = vector.broadcast %cst_64 : f32 to vector<2x128xf32>
      %c0_65 = arith.constant 0 : index
      %c0_66 = arith.constant 0 : index
      %282 = vector.load %arg8[%c0_65, %c0_66] : memref<2x128xf32, #tpu.memory_space<vmem>>, vector<2x128xf32>
      tpu.vector_store %arg8[%c0_65, %c0_66], %281 {strides = array<i32>} : memref<2x128xf32, #tpu.memory_space<vmem>>, vector<2x128xf32>,
    } else {
    }
    %c0 = arith.constant 0 : index
    %c0_1 = arith.constant 0 : index
    %3 = vector.load %arg3[%c0, %c0_1] : memref<128x384xf32, #tpu.memory_space<vmem>>, vector<128x384xf32>
    %c0_2 = arith.constant 0 : index
    %c0_3 = arith.constant 0 : index
    %4 = vector.load %arg4[%c0_2, %c0_3] : memref<128x384xf32, #tpu.memory_space<vmem>>, vector<128x384xf32>
    %c0_4 = arith.constant 0 : index
    %c0_5 = arith.constant 0 : index
    %5 = vector.load %arg6[%c0_4, %c0_5] : memref<1x128xf32, #tpu.memory_space<vmem>>, vector<1x128xf32>
    %6 = vector.shape_cast %5 : vector<1x128xf32> to vector<1x128xf32>
    %7 = vector.broadcast %6 : vector<1x128xf32> to vector<2x128xf32>
    %c0_6 = arith.constant 0 : index
    %c0_7 = arith.constant 0 : index
    %c0_8 = arith.constant 0 : index
    %8 = vector.load %arg2[%c0_6, %c0_7, %c0_8] : memref<8x2x128xf32, #tpu.memory_space<vmem>>, vector<8x2x128xf32>
    %9 = vector.shape_cast %8 : vector<8x2x128xf32> to vector<16x128xf32>
    %cst = arith.constant dense<0.000000e+00> : vector<16x384xf32>
    %10 = tpu.matmul %9, %3, %cst {dimension_numbers = #tpu.dot_dimension_numbers<[1], [0], [0], [1], [0, 0, 1, 1], [], []>} : vector<16x128xf32>, vector<128x384xf32>, vector<16x384xf32> -> vector<16x384xf32>
    %c0_9 = arith.constant 0 : index
    %c0_10 = arith.constant 0 : index
    %11 = vector.load %arg5[%c0_9, %c0_10] : memref<1x384xf32, #tpu.memory_space<vmem>>, vector<1x384xf32>
    %12 = vector.broadcast %11 : vector<1x384xf32> to vector<16x384xf32>
    %13 = arith.addf %10, %12 : vector<16x384xf32>
    %14 = vector.shape_cast %13 : vector<16x384xf32> to vector<8x2x384xf32>
    %c0_11 = arith.constant 0 : index
    %c0_12 = arith.constant 0 : index
    %15 = vector.load %arg8[%c0_11, %c0_12] : memref<2x128xf32, #tpu.memory_space<vmem>>, vector<2x128xf32>
    %16 = vector.extract_strided_slice %14 {offsets = [0, 0, 0], sizes = [1, 2, 384], strides = [1, 1, 1]} : vector<8x2x384xf32> to vector<1x2x384xf32>
    %17 = vector.shape_cast %16 : vector<1x2x384xf32> to vector<2x384xf32>
    %cst_13 = arith.constant dense<0.000000e+00> : vector<2x384xf32>
    %18 = tpu.matmul %15, %4, %cst_13 {dimension_numbers = #tpu.dot_dimension_numbers<[1], [0], [0], [1], [0, 0, 1, 1], [], []>} : vector<2x128xf32>, vector<128x384xf32>, vector<2x384xf32> -> vector<2x384xf32>
    %19 = vector.extract_strided_slice %17 {offsets = [0, 0], sizes = [2, 128], strides = [1, 1]} : vector<2x384xf32> to vector<2x128xf32>
    %20 = vector.extract_strided_slice %18 {offsets = [0, 0], sizes = [2, 128], strides = [1, 1]} : vector<2x384xf32> to vector<2x128xf32>
    %21 = arith.addf %19, %20 : vector<2x128xf32>
    %22 = arith.negf %21 : vector<2x128xf32>
    %23 = math.exp %22 : vector<2x128xf32>
    %cst_14 = arith.constant 1.000000e+00 : f32
    %24 = vector.broadcast %cst_14 : f32 to vector<2x128xf32>
    %25 = arith.addf %24, %23 : vector<2x128xf32>
    %26 = arith.divf %24, %25 : vector<2x128xf32>
    %27 = vector.extract_strided_slice %17 {offsets = [0, 128], sizes = [2, 128], strides = [1, 1]} : vector<2x384xf32> to vector<2x128xf32>
    %28 = vector.extract_strided_slice %18 {offsets = [0, 128], sizes = [2, 128], strides = [1, 1]} : vector<2x384xf32> to vector<2x128xf32>
    %29 = arith.addf %27, %28 : vector<2x128xf32>
    %30 = arith.negf %29 : vector<2x128xf32>
    %31 = math.exp %30 : vector<2x128xf32>
    %cst_15 = arith.constant 1.000000e+00 : f32
    %32 = vector.broadcast %cst_15 : f32 to vector<2x128xf32>
    %33 = arith.addf %32, %31 : vector<2x128xf32>
    %34 = arith.divf %32, %33 : vector<2x128xf32>
    %35 = vector.extract_strided_slice %17 {offsets = [0, 256], sizes = [2, 128], strides = [1, 1]} : vector<2x384xf32> to vector<2x128xf32>
    %36 = vector.extract_strided_slice %18 {offsets = [0, 256], sizes = [2, 128], strides = [1, 1]} : vector<2x384xf32> to vector<2x128xf32>
    %37 = arith.addf %36, %7 : vector<2x128xf32>
    %38 = arith.mulf %26, %37 : vector<2x128xf32>
    %39 = arith.addf %35, %38 : vector<2x128xf32>
    %40 = math.tanh %39 : vector<2x128xf32>
    %cst_16 = arith.constant 1.000000e+00 : f32
    %41 = vector.broadcast %cst_16 : f32 to vector<2x128xf32>
    %42 = arith.subf %41, %34 : vector<2x128xf32>
    %43 = arith.mulf %42, %40 : vector<2x128xf32>
    %44 = arith.mulf %34, %15 : vector<2x128xf32>
    %45 = arith.addf %43, %44 : vector<2x128xf32>
    %c0_17 = arith.constant 0 : index
    %c0_18 = arith.constant 0 : index
    %c0_19 = arith.constant 0 : index
    %46 = vector.load %arg7[%c0_17, %c0_18, %c0_19] : memref<8x2x128xf32, #tpu.memory_space<vmem>>, vector<1x2x128xf32>
    %47 = vector.shape_cast %46 : vector<1x2x128xf32> to vector<2x128xf32>
    %48 = vector.shape_cast %45 : vector<2x128xf32> to vector<1x2x128xf32>
    tpu.vector_store %arg7[%c0_17, %c0_18, %c0_19], %48 {strides = array<i32>} : memref<8x2x128xf32, #tpu.memory_space<vmem>>, vector<1x2x128xf32>,
    %49 = vector.extract_strided_slice %14 {offsets = [1, 0, 0], sizes = [1, 2, 384], strides = [1, 1, 1]} : vector<8x2x384xf32> to vector<1x2x384xf32>
    %50 = vector.shape_cast %49 : vector<1x2x384xf32> to vector<2x384xf32>
    %cst_20 = arith.constant dense<0.000000e+00> : vector<2x384xf32>
    %51 = tpu.matmul %45, %4, %cst_20 {dimension_numbers = #tpu.dot_dimension_numbers<[1], [0], [0], [1], [0, 0, 1, 1], [], []>} : vector<2x128xf32>, vector<128x384xf32>, vector<2x384xf32> -> vector<2x384xf32>
    %52 = vector.extract_strided_slice %50 {offsets = [0, 0], sizes = [2, 128], strides = [1, 1]} : vector<2x384xf32> to vector<2x128xf32>
    %53 = vector.extract_strided_slice %51 {offsets = [0, 0], sizes = [2, 128], strides = [1, 1]} : vector<2x384xf32> to vector<2x128xf32>
    %54 = arith.addf %52, %53 : vector<2x128xf32>
    %55 = arith.negf %54 : vector<2x128xf32>
    %56 = math.exp %55 : vector<2x128xf32>
    %cst_21 = arith.constant 1.000000e+00 : f32
    %57 = vector.broadcast %cst_21 : f32 to vector<2x128xf32>
    %58 = arith.addf %57, %56 : vector<2x128xf32>
    %59 = arith.divf %57, %58 : vector<2x128xf32>
    %60 = vector.extract_strided_slice %50 {offsets = [0, 128], sizes = [2, 128], strides = [1, 1]} : vector<2x384xf32> to vector<2x128xf32>
    %61 = vector.extract_strided_slice %51 {offsets = [0, 128], sizes = [2, 128], strides = [1, 1]} : vector<2x384xf32> to vector<2x128xf32>
    %62 = arith.addf %60, %61 : vector<2x128xf32>
    %63 = arith.negf %62 : vector<2x128xf32>
    %64 = math.exp %63 : vector<2x128xf32>
    %cst_22 = arith.constant 1.000000e+00 : f32
    %65 = vector.broadcast %cst_22 : f32 to vector<2x128xf32>
    %66 = arith.addf %65, %64 : vector<2x128xf32>
    %67 = arith.divf %65, %66 : vector<2x128xf32>
    %68 = vector.extract_strided_slice %50 {offsets = [0, 256], sizes = [2, 128], strides = [1, 1]} : vector<2x384xf32> to vector<2x128xf32>
    %69 = vector.extract_strided_slice %51 {offsets = [0, 256], sizes = [2, 128], strides = [1, 1]} : vector<2x384xf32> to vector<2x128xf32>
    %70 = arith.addf %69, %7 : vector<2x128xf32>
    %71 = arith.mulf %59, %70 : vector<2x128xf32>
    %72 = arith.addf %68, %71 : vector<2x128xf32>
    %73 = math.tanh %72 : vector<2x128xf32>
    %cst_23 = arith.constant 1.000000e+00 : f32
    %74 = vector.broadcast %cst_23 : f32 to vector<2x128xf32>
    %75 = arith.subf %74, %67 : vector<2x128xf32>
    %76 = arith.mulf %75, %73 : vector<2x128xf32>
    %77 = arith.mulf %67, %45 : vector<2x128xf32>
    %78 = arith.addf %76, %77 : vector<2x128xf32>
    %c1 = arith.constant 1 : index
    %c0_24 = arith.constant 0 : index
    %c0_25 = arith.constant 0 : index
    %79 = vector.load %arg7[%c1, %c0_24, %c0_25] : memref<8x2x128xf32, #tpu.memory_space<vmem>>, vector<1x2x128xf32>
    %80 = vector.shape_cast %79 : vector<1x2x128xf32> to vector<2x128xf32>
    %81 = vector.shape_cast %78 : vector<2x128xf32> to vector<1x2x128xf32>
    tpu.vector_store %arg7[%c1, %c0_24, %c0_25], %81 {strides = array<i32>} : memref<8x2x128xf32, #tpu.memory_space<vmem>>, vector<1x2x128xf32>,
    %82 = vector.extract_strided_slice %14 {offsets = [2, 0, 0], sizes = [1, 2, 384], strides = [1, 1, 1]} : vector<8x2x384xf32> to vector<1x2x384xf32>
    %83 = vector.shape_cast %82 : vector<1x2x384xf32> to vector<2x384xf32>
    %cst_26 = arith.constant dense<0.000000e+00> : vector<2x384xf32>
    %84 = tpu.matmul %78, %4, %cst_26 {dimension_numbers = #tpu.dot_dimension_numbers<[1], [0], [0], [1], [0, 0, 1, 1], [], []>} : vector<2x128xf32>, vector<128x384xf32>, vector<2x384xf32> -> vector<2x384xf32>
    %85 = vector.extract_strided_slice %83 {offsets = [0, 0], sizes = [2, 128], strides = [1, 1]} : vector<2x384xf32> to vector<2x128xf32>
    %86 = vector.extract_strided_slice %84 {offsets = [0, 0], sizes = [2, 128], strides = [1, 1]} : vector<2x384xf32> to vector<2x128xf32>
    %87 = arith.addf %85, %86 : vector<2x128xf32>
    %88 = arith.negf %87 : vector<2x128xf32>
    %89 = math.exp %88 : vector<2x128xf32>
    %cst_27 = arith.constant 1.000000e+00 : f32
    %90 = vector.broadcast %cst_27 : f32 to vector<2x128xf32>
    %91 = arith.addf %90, %89 : vector<2x128xf32>
    %92 = arith.divf %90, %91 : vector<2x128xf32>
    %93 = vector.extract_strided_slice %83 {offsets = [0, 128], sizes = [2, 128], strides = [1, 1]} : vector<2x384xf32> to vector<2x128xf32>
    %94 = vector.extract_strided_slice %84 {offsets = [0, 128], sizes = [2, 128], strides = [1, 1]} : vector<2x384xf32> to vector<2x128xf32>
    %95 = arith.addf %93, %94 : vector<2x128xf32>
    %96 = arith.negf %95 : vector<2x128xf32>
    %97 = math.exp %96 : vector<2x128xf32>
    %cst_28 = arith.constant 1.000000e+00 : f32
    %98 = vector.broadcast %cst_28 : f32 to vector<2x128xf32>
    %99 = arith.addf %98, %97 : vector<2x128xf32>
    %100 = arith.divf %98, %99 : vector<2x128xf32>
    %101 = vector.extract_strided_slice %83 {offsets = [0, 256], sizes = [2, 128], strides = [1, 1]} : vector<2x384xf32> to vector<2x128xf32>
    %102 = vector.extract_strided_slice %84 {offsets = [0, 256], sizes = [2, 128], strides = [1, 1]} : vector<2x384xf32> to vector<2x128xf32>
    %103 = arith.addf %102, %7 : vector<2x128xf32>
    %104 = arith.mulf %92, %103 : vector<2x128xf32>
    %105 = arith.addf %101, %104 : vector<2x128xf32>
    %106 = math.tanh %105 : vector<2x128xf32>
    %cst_29 = arith.constant 1.000000e+00 : f32
    %107 = vector.broadcast %cst_29 : f32 to vector<2x128xf32>
    %108 = arith.subf %107, %100 : vector<2x128xf32>
    %109 = arith.mulf %108, %106 : vector<2x128xf32>
    %110 = arith.mulf %100, %78 : vector<2x128xf32>
    %111 = arith.addf %109, %110 : vector<2x128xf32>
    %c2 = arith.constant 2 : index
    %c0_30 = arith.constant 0 : index
    %c0_31 = arith.constant 0 : index
    %112 = vector.load %arg7[%c2, %c0_30, %c0_31] : memref<8x2x128xf32, #tpu.memory_space<vmem>>, vector<1x2x128xf32>
    %113 = vector.shape_cast %112 : vector<1x2x128xf32> to vector<2x128xf32>
    %114 = vector.shape_cast %111 : vector<2x128xf32> to vector<1x2x128xf32>
    tpu.vector_store %arg7[%c2, %c0_30, %c0_31], %114 {strides = array<i32>} : memref<8x2x128xf32, #tpu.memory_space<vmem>>, vector<1x2x128xf32>,
    %115 = vector.extract_strided_slice %14 {offsets = [3, 0, 0], sizes = [1, 2, 384], strides = [1, 1, 1]} : vector<8x2x384xf32> to vector<1x2x384xf32>
    %116 = vector.shape_cast %115 : vector<1x2x384xf32> to vector<2x384xf32>
    %cst_32 = arith.constant dense<0.000000e+00> : vector<2x384xf32>
    %117 = tpu.matmul %111, %4, %cst_32 {dimension_numbers = #tpu.dot_dimension_numbers<[1], [0], [0], [1], [0, 0, 1, 1], [], []>} : vector<2x128xf32>, vector<128x384xf32>, vector<2x384xf32> -> vector<2x384xf32>
    %118 = vector.extract_strided_slice %116 {offsets = [0, 0], sizes = [2, 128], strides = [1, 1]} : vector<2x384xf32> to vector<2x128xf32>
    %119 = vector.extract_strided_slice %117 {offsets = [0, 0], sizes = [2, 128], strides = [1, 1]} : vector<2x384xf32> to vector<2x128xf32>
    %120 = arith.addf %118, %119 : vector<2x128xf32>
    %121 = arith.negf %120 : vector<2x128xf32>
    %122 = math.exp %121 : vector<2x128xf32>
    %cst_33 = arith.constant 1.000000e+00 : f32
    %123 = vector.broadcast %cst_33 : f32 to vector<2x128xf32>
    %124 = arith.addf %123, %122 : vector<2x128xf32>
    %125 = arith.divf %123, %124 : vector<2x128xf32>
    %126 = vector.extract_strided_slice %116 {offsets = [0, 128], sizes = [2, 128], strides = [1, 1]} : vector<2x384xf32> to vector<2x128xf32>
    %127 = vector.extract_strided_slice %117 {offsets = [0, 128], sizes = [2, 128], strides = [1, 1]} : vector<2x384xf32> to vector<2x128xf32>
    %128 = arith.addf %126, %127 : vector<2x128xf32>
    %129 = arith.negf %128 : vector<2x128xf32>
    %130 = math.exp %129 : vector<2x128xf32>
    %cst_34 = arith.constant 1.000000e+00 : f32
    %131 = vector.broadcast %cst_34 : f32 to vector<2x128xf32>
    %132 = arith.addf %131, %130 : vector<2x128xf32>
    %133 = arith.divf %131, %132 : vector<2x128xf32>
    %134 = vector.extract_strided_slice %116 {offsets = [0, 256], sizes = [2, 128], strides = [1, 1]} : vector<2x384xf32> to vector<2x128xf32>
    %135 = vector.extract_strided_slice %117 {offsets = [0, 256], sizes = [2, 128], strides = [1, 1]} : vector<2x384xf32> to vector<2x128xf32>
    %136 = arith.addf %135, %7 : vector<2x128xf32>
    %137 = arith.mulf %125, %136 : vector<2x128xf32>
    %138 = arith.addf %134, %137 : vector<2x128xf32>
    %139 = math.tanh %138 : vector<2x128xf32>
    %cst_35 = arith.constant 1.000000e+00 : f32
    %140 = vector.broadcast %cst_35 : f32 to vector<2x128xf32>
    %141 = arith.subf %140, %133 : vector<2x128xf32>
    %142 = arith.mulf %141, %139 : vector<2x128xf32>
    %143 = arith.mulf %133, %111 : vector<2x128xf32>
    %144 = arith.addf %142, %143 : vector<2x128xf32>
    %c3 = arith.constant 3 : index
    %c0_36 = arith.constant 0 : index
    %c0_37 = arith.constant 0 : index
    %145 = vector.load %arg7[%c3, %c0_36, %c0_37] : memref<8x2x128xf32, #tpu.memory_space<vmem>>, vector<1x2x128xf32>
    %146 = vector.shape_cast %145 : vector<1x2x128xf32> to vector<2x128xf32>
    %147 = vector.shape_cast %144 : vector<2x128xf32> to vector<1x2x128xf32>
    tpu.vector_store %arg7[%c3, %c0_36, %c0_37], %147 {strides = array<i32>} : memref<8x2x128xf32, #tpu.memory_space<vmem>>, vector<1x2x128xf32>,
    %148 = vector.extract_strided_slice %14 {offsets = [4, 0, 0], sizes = [1, 2, 384], strides = [1, 1, 1]} : vector<8x2x384xf32> to vector<1x2x384xf32>
    %149 = vector.shape_cast %148 : vector<1x2x384xf32> to vector<2x384xf32>
    %cst_38 = arith.constant dense<0.000000e+00> : vector<2x384xf32>
    %150 = tpu.matmul %144, %4, %cst_38 {dimension_numbers = #tpu.dot_dimension_numbers<[1], [0], [0], [1], [0, 0, 1, 1], [], []>} : vector<2x128xf32>, vector<128x384xf32>, vector<2x384xf32> -> vector<2x384xf32>
    %151 = vector.extract_strided_slice %149 {offsets = [0, 0], sizes = [2, 128], strides = [1, 1]} : vector<2x384xf32> to vector<2x128xf32>
    %152 = vector.extract_strided_slice %150 {offsets = [0, 0], sizes = [2, 128], strides = [1, 1]} : vector<2x384xf32> to vector<2x128xf32>
    %153 = arith.addf %151, %152 : vector<2x128xf32>
    %154 = arith.negf %153 : vector<2x128xf32>
    %155 = math.exp %154 : vector<2x128xf32>
    %cst_39 = arith.constant 1.000000e+00 : f32
    %156 = vector.broadcast %cst_39 : f32 to vector<2x128xf32>
    %157 = arith.addf %156, %155 : vector<2x128xf32>
    %158 = arith.divf %156, %157 : vector<2x128xf32>
    %159 = vector.extract_strided_slice %149 {offsets = [0, 128], sizes = [2, 128], strides = [1, 1]} : vector<2x384xf32> to vector<2x128xf32>
    %160 = vector.extract_strided_slice %150 {offsets = [0, 128], sizes = [2, 128], strides = [1, 1]} : vector<2x384xf32> to vector<2x128xf32>
    %161 = arith.addf %159, %160 : vector<2x128xf32>
    %162 = arith.negf %161 : vector<2x128xf32>
    %163 = math.exp %162 : vector<2x128xf32>
    %cst_40 = arith.constant 1.000000e+00 : f32
    %164 = vector.broadcast %cst_40 : f32 to vector<2x128xf32>
    %165 = arith.addf %164, %163 : vector<2x128xf32>
    %166 = arith.divf %164, %165 : vector<2x128xf32>
    %167 = vector.extract_strided_slice %149 {offsets = [0, 256], sizes = [2, 128], strides = [1, 1]} : vector<2x384xf32> to vector<2x128xf32>
    %168 = vector.extract_strided_slice %150 {offsets = [0, 256], sizes = [2, 128], strides = [1, 1]} : vector<2x384xf32> to vector<2x128xf32>
    %169 = arith.addf %168, %7 : vector<2x128xf32>
    %170 = arith.mulf %158, %169 : vector<2x128xf32>
    %171 = arith.addf %167, %170 : vector<2x128xf32>
    %172 = math.tanh %171 : vector<2x128xf32>
    %cst_41 = arith.constant 1.000000e+00 : f32
    %173 = vector.broadcast %cst_41 : f32 to vector<2x128xf32>
    %174 = arith.subf %173, %166 : vector<2x128xf32>
    %175 = arith.mulf %174, %172 : vector<2x128xf32>
    %176 = arith.mulf %166, %144 : vector<2x128xf32>
    %177 = arith.addf %175, %176 : vector<2x128xf32>
    %c4 = arith.constant 4 : index
    %c0_42 = arith.constant 0 : index
    %c0_43 = arith.constant 0 : index
    %178 = vector.load %arg7[%c4, %c0_42, %c0_43] : memref<8x2x128xf32, #tpu.memory_space<vmem>>, vector<1x2x128xf32>
    %179 = vector.shape_cast %178 : vector<1x2x128xf32> to vector<2x128xf32>
    %180 = vector.shape_cast %177 : vector<2x128xf32> to vector<1x2x128xf32>
    tpu.vector_store %arg7[%c4, %c0_42, %c0_43], %180 {strides = array<i32>} : memref<8x2x128xf32, #tpu.memory_space<vmem>>, vector<1x2x128xf32>,
    %181 = vector.extract_strided_slice %14 {offsets = [5, 0, 0], sizes = [1, 2, 384], strides = [1, 1, 1]} : vector<8x2x384xf32> to vector<1x2x384xf32>
    %182 = vector.shape_cast %181 : vector<1x2x384xf32> to vector<2x384xf32>
    %cst_44 = arith.constant dense<0.000000e+00> : vector<2x384xf32>
    %183 = tpu.matmul %177, %4, %cst_44 {dimension_numbers = #tpu.dot_dimension_numbers<[1], [0], [0], [1], [0, 0, 1, 1], [], []>} : vector<2x128xf32>, vector<128x384xf32>, vector<2x384xf32> -> vector<2x384xf32>
    %184 = vector.extract_strided_slice %182 {offsets = [0, 0], sizes = [2, 128], strides = [1, 1]} : vector<2x384xf32> to vector<2x128xf32>
    %185 = vector.extract_strided_slice %183 {offsets = [0, 0], sizes = [2, 128], strides = [1, 1]} : vector<2x384xf32> to vector<2x128xf32>
    %186 = arith.addf %184, %185 : vector<2x128xf32>
    %187 = arith.negf %186 : vector<2x128xf32>
    %188 = math.exp %187 : vector<2x128xf32>
    %cst_45 = arith.constant 1.000000e+00 : f32
    %189 = vector.broadcast %cst_45 : f32 to vector<2x128xf32>
    %190 = arith.addf %189, %188 : vector<2x128xf32>
    %191 = arith.divf %189, %190 : vector<2x128xf32>
    %192 = vector.extract_strided_slice %182 {offsets = [0, 128], sizes = [2, 128], strides = [1, 1]} : vector<2x384xf32> to vector<2x128xf32>
    %193 = vector.extract_strided_slice %183 {offsets = [0, 128], sizes = [2, 128], strides = [1, 1]} : vector<2x384xf32> to vector<2x128xf32>
    %194 = arith.addf %192, %193 : vector<2x128xf32>
    %195 = arith.negf %194 : vector<2x128xf32>
    %196 = math.exp %195 : vector<2x128xf32>
    %cst_46 = arith.constant 1.000000e+00 : f32
    %197 = vector.broadcast %cst_46 : f32 to vector<2x128xf32>
    %198 = arith.addf %197, %196 : vector<2x128xf32>
    %199 = arith.divf %197, %198 : vector<2x128xf32>
    %200 = vector.extract_strided_slice %182 {offsets = [0, 256], sizes = [2, 128], strides = [1, 1]} : vector<2x384xf32> to vector<2x128xf32>
    %201 = vector.extract_strided_slice %183 {offsets = [0, 256], sizes = [2, 128], strides = [1, 1]} : vector<2x384xf32> to vector<2x128xf32>
    %202 = arith.addf %201, %7 : vector<2x128xf32>
    %203 = arith.mulf %191, %202 : vector<2x128xf32>
    %204 = arith.addf %200, %203 : vector<2x128xf32>
    %205 = math.tanh %204 : vector<2x128xf32>
    %cst_47 = arith.constant 1.000000e+00 : f32
    %206 = vector.broadcast %cst_47 : f32 to vector<2x128xf32>
    %207 = arith.subf %206, %199 : vector<2x128xf32>
    %208 = arith.mulf %207, %205 : vector<2x128xf32>
    %209 = arith.mulf %199, %177 : vector<2x128xf32>
    %210 = arith.addf %208, %209 : vector<2x128xf32>
    %c5 = arith.constant 5 : index
    %c0_48 = arith.constant 0 : index
    %c0_49 = arith.constant 0 : index
    %211 = vector.load %arg7[%c5, %c0_48, %c0_49] : memref<8x2x128xf32, #tpu.memory_space<vmem>>, vector<1x2x128xf32>
    %212 = vector.shape_cast %211 : vector<1x2x128xf32> to vector<2x128xf32>
    %213 = vector.shape_cast %210 : vector<2x128xf32> to vector<1x2x128xf32>
    tpu.vector_store %arg7[%c5, %c0_48, %c0_49], %213 {strides = array<i32>} : memref<8x2x128xf32, #tpu.memory_space<vmem>>, vector<1x2x128xf32>,
    %214 = vector.extract_strided_slice %14 {offsets = [6, 0, 0], sizes = [1, 2, 384], strides = [1, 1, 1]} : vector<8x2x384xf32> to vector<1x2x384xf32>
    %215 = vector.shape_cast %214 : vector<1x2x384xf32> to vector<2x384xf32>
    %cst_50 = arith.constant dense<0.000000e+00> : vector<2x384xf32>
    %216 = tpu.matmul %210, %4, %cst_50 {dimension_numbers = #tpu.dot_dimension_numbers<[1], [0], [0], [1], [0, 0, 1, 1], [], []>} : vector<2x128xf32>, vector<128x384xf32>, vector<2x384xf32> -> vector<2x384xf32>
    %217 = vector.extract_strided_slice %215 {offsets = [0, 0], sizes = [2, 128], strides = [1, 1]} : vector<2x384xf32> to vector<2x128xf32>
    %218 = vector.extract_strided_slice %216 {offsets = [0, 0], sizes = [2, 128], strides = [1, 1]} : vector<2x384xf32> to vector<2x128xf32>
    %219 = arith.addf %217, %218 : vector<2x128xf32>
    %220 = arith.negf %219 : vector<2x128xf32>
    %221 = math.exp %220 : vector<2x128xf32>
    %cst_51 = arith.constant 1.000000e+00 : f32
    %222 = vector.broadcast %cst_51 : f32 to vector<2x128xf32>
    %223 = arith.addf %222, %221 : vector<2x128xf32>
    %224 = arith.divf %222, %223 : vector<2x128xf32>
    %225 = vector.extract_strided_slice %215 {offsets = [0, 128], sizes = [2, 128], strides = [1, 1]} : vector<2x384xf32> to vector<2x128xf32>
    %226 = vector.extract_strided_slice %216 {offsets = [0, 128], sizes = [2, 128], strides = [1, 1]} : vector<2x384xf32> to vector<2x128xf32>
    %227 = arith.addf %225, %226 : vector<2x128xf32>
    %228 = arith.negf %227 : vector<2x128xf32>
    %229 = math.exp %228 : vector<2x128xf32>
    %cst_52 = arith.constant 1.000000e+00 : f32
    %230 = vector.broadcast %cst_52 : f32 to vector<2x128xf32>
    %231 = arith.addf %230, %229 : vector<2x128xf32>
    %232 = arith.divf %230, %231 : vector<2x128xf32>
    %233 = vector.extract_strided_slice %215 {offsets = [0, 256], sizes = [2, 128], strides = [1, 1]} : vector<2x384xf32> to vector<2x128xf32>
    %234 = vector.extract_strided_slice %216 {offsets = [0, 256], sizes = [2, 128], strides = [1, 1]} : vector<2x384xf32> to vector<2x128xf32>
    %235 = arith.addf %234, %7 : vector<2x128xf32>
    %236 = arith.mulf %224, %235 : vector<2x128xf32>
    %237 = arith.addf %233, %236 : vector<2x128xf32>
    %238 = math.tanh %237 : vector<2x128xf32>
    %cst_53 = arith.constant 1.000000e+00 : f32
    %239 = vector.broadcast %cst_53 : f32 to vector<2x128xf32>
    %240 = arith.subf %239, %232 : vector<2x128xf32>
    %241 = arith.mulf %240, %238 : vector<2x128xf32>
    %242 = arith.mulf %232, %210 : vector<2x128xf32>
    %243 = arith.addf %241, %242 : vector<2x128xf32>
    %c6 = arith.constant 6 : index
    %c0_54 = arith.constant 0 : index
    %c0_55 = arith.constant 0 : index
    %244 = vector.load %arg7[%c6, %c0_54, %c0_55] : memref<8x2x128xf32, #tpu.memory_space<vmem>>, vector<1x2x128xf32>
    %245 = vector.shape_cast %244 : vector<1x2x128xf32> to vector<2x128xf32>
    %246 = vector.shape_cast %243 : vector<2x128xf32> to vector<1x2x128xf32>
    tpu.vector_store %arg7[%c6, %c0_54, %c0_55], %246 {strides = array<i32>} : memref<8x2x128xf32, #tpu.memory_space<vmem>>, vector<1x2x128xf32>,
    %247 = vector.extract_strided_slice %14 {offsets = [7, 0, 0], sizes = [1, 2, 384], strides = [1, 1, 1]} : vector<8x2x384xf32> to vector<1x2x384xf32>
    %248 = vector.shape_cast %247 : vector<1x2x384xf32> to vector<2x384xf32>
    %cst_56 = arith.constant dense<0.000000e+00> : vector<2x384xf32>
    %249 = tpu.matmul %243, %4, %cst_56 {dimension_numbers = #tpu.dot_dimension_numbers<[1], [0], [0], [1], [0, 0, 1, 1], [], []>} : vector<2x128xf32>, vector<128x384xf32>, vector<2x384xf32> -> vector<2x384xf32>
    %250 = vector.extract_strided_slice %248 {offsets = [0, 0], sizes = [2, 128], strides = [1, 1]} : vector<2x384xf32> to vector<2x128xf32>
    %251 = vector.extract_strided_slice %249 {offsets = [0, 0], sizes = [2, 128], strides = [1, 1]} : vector<2x384xf32> to vector<2x128xf32>
    %252 = arith.addf %250, %251 : vector<2x128xf32>
    %253 = arith.negf %252 : vector<2x128xf32>
    %254 = math.exp %253 : vector<2x128xf32>
    %cst_57 = arith.constant 1.000000e+00 : f32
    %255 = vector.broadcast %cst_57 : f32 to vector<2x128xf32>
    %256 = arith.addf %255, %254 : vector<2x128xf32>
    %257 = arith.divf %255, %256 : vector<2x128xf32>
    %258 = vector.extract_strided_slice %248 {offsets = [0, 128], sizes = [2, 128], strides = [1, 1]} : vector<2x384xf32> to vector<2x128xf32>
    %259 = vector.extract_strided_slice %249 {offsets = [0, 128], sizes = [2, 128], strides = [1, 1]} : vector<2x384xf32> to vector<2x128xf32>
    %260 = arith.addf %258, %259 : vector<2x128xf32>
    %261 = arith.negf %260 : vector<2x128xf32>
    %262 = math.exp %261 : vector<2x128xf32>
    %cst_58 = arith.constant 1.000000e+00 : f32
    %263 = vector.broadcast %cst_58 : f32 to vector<2x128xf32>
    %264 = arith.addf %263, %262 : vector<2x128xf32>
    %265 = arith.divf %263, %264 : vector<2x128xf32>
    %266 = vector.extract_strided_slice %248 {offsets = [0, 256], sizes = [2, 128], strides = [1, 1]} : vector<2x384xf32> to vector<2x128xf32>
    %267 = vector.extract_strided_slice %249 {offsets = [0, 256], sizes = [2, 128], strides = [1, 1]} : vector<2x384xf32> to vector<2x128xf32>
    %268 = arith.addf %267, %7 : vector<2x128xf32>
    %269 = arith.mulf %257, %268 : vector<2x128xf32>
    %270 = arith.addf %266, %269 : vector<2x128xf32>
    %271 = math.tanh %270 : vector<2x128xf32>
    %cst_59 = arith.constant 1.000000e+00 : f32
    %272 = vector.broadcast %cst_59 : f32 to vector<2x128xf32>
    %273 = arith.subf %272, %265 : vector<2x128xf32>
    %274 = arith.mulf %273, %271 : vector<2x128xf32>
    %275 = arith.mulf %265, %243 : vector<2x128xf32>
    %276 = arith.addf %274, %275 : vector<2x128xf32>
    %c7 = arith.constant 7 : index
    %c0_60 = arith.constant 0 : index
    %c0_61 = arith.constant 0 : index
    %277 = vector.load %arg7[%c7, %c0_60, %c0_61] : memref<8x2x128xf32, #tpu.memory_space<vmem>>, vector<1x2x128xf32>
    %278 = vector.shape_cast %277 : vector<1x2x128xf32> to vector<2x128xf32>
    %279 = vector.shape_cast %276 : vector<2x128xf32> to vector<1x2x128xf32>
    tpu.vector_store %arg7[%c7, %c0_60, %c0_61], %279 {strides = array<i32>} : memref<8x2x128xf32, #tpu.memory_space<vmem>>, vector<1x2x128xf32>,
    %c0_62 = arith.constant 0 : index
    %c0_63 = arith.constant 0 : index
    %280 = vector.load %arg8[%c0_62, %c0_63] : memref<2x128xf32, #tpu.memory_space<vmem>>, vector<2x128xf32>
    tpu.vector_store %arg8[%c0_62, %c0_63], %276 {strides = array<i32>} : memref<2x128xf32, #tpu.memory_space<vmem>>, vector<2x128xf32>,
    return
  }
  func.func @transform_0(%arg0: i32, %arg1: i32) -> (i32, i32, i32) {
    %c0_i32 = arith.constant 0 : i32
    %c0_i32_0 = arith.constant 0 : i32
    return %arg1, %arg0, %c0_i32 : i32, i32, i32
  }
  func.func @transform_1(%arg0: i32, %arg1: i32) -> (i32, i32) {
    %c0_i32 = arith.constant 0 : i32
    %c0_i32_0 = arith.constant 0 : i32
    %c0_i32_1 = arith.constant 0 : i32
    return %c0_i32, %c0_i32_0 : i32, i32
  }
  func.func @transform_2(%arg0: i32, %arg1: i32) -> (i32, i32) {
    %c0_i32 = arith.constant 0 : i32
    %c0_i32_0 = arith.constant 0 : i32
    %c0_i32_1 = arith.constant 0 : i32
    return %c0_i32, %c0_i32_0 : i32, i32
  }
  func.func @transform_3(%arg0: i32, %arg1: i32) -> (i32, i32) {
    %c0_i32 = arith.constant 0 : i32
    %c0_i32_0 = arith.constant 0 : i32
    %c0_i32_1 = arith.constant 0 : i32
    return %c0_i32, %c0_i32_0 : i32, i32
  }
  func.func @transform_4(%arg0: i32, %arg1: i32) -> (i32, i32) {
    %c0_i32 = arith.constant 0 : i32
    %c0_i32_0 = arith.constant 0 : i32
    %c0_i32_1 = arith.constant 0 : i32
    return %c0_i32, %c0_i32_0 : i32, i32
  }
  func.func @transform_5(%arg0: i32, %arg1: i32) -> (i32, i32, i32) {
    %c0_i32 = arith.constant 0 : i32
    %c0_i32_0 = arith.constant 0 : i32
    return %arg1, %arg0, %c0_i32 : i32, i32, i32
  }
}

</mosaic_0001>

<bundles_post_ra>
// kernel: tpu_custom_call.1
= control target key start
LH: loop header
LB: loop body
LE: loop exit
PB: predicated region body
PF: predicated region fallthrough
CT: control target
= control target key end

     0   :  { %10 = vsyncpa [#allocation4], 0  ;;  %s3575_s0 = inlined_call_operand.hbm [shape: f32[8,2,128], index: 0, kind: input, shape index: {}]   ;;  %s3576_s1 = inlined_call_operand.hbm [shape: f32[128,384], index: 1, kind: input, shape index: {}]   ;;  %s3577_s2 = inlined_call_operand.hbm [shape: f32[128,384], index: 2, kind: input, shape index: {}]   ;;  %s3578_s3 = inlined_call_operand.vmem [shape: f32[1,384], index: 3, kind: input, shape index: {}]   ;;  %s3579_s4 = inlined_call_operand.vmem [shape: f32[1,128], index: 4, kind: input, shape index: {}]   ;;  %s3580_s5 = inlined_call_operand.hbm [shape: f32[8,2,128], index: 5, kind: output, shape index: {}]  }
   0x1   :  { %11 = vsyncpa [#allocation7], 0 }
   0x2   :  { %12 = vsyncpa [#allocation5], 0  ;;  %s3030_s18 = smov [#allocation6]   ;;  %s2936_s22 = scalar_lea.hbm %s3576_s1, 6144 }
   0x3   :  { %s30_s19 = sshll.u32 %s3030_s18, 4  ;;  %p2937_p0 = scmp.ne.s32.totalorder %s3576_s1, %s2936_s22  ;;  %s31_s19 = int_to_ptr.vmem [resolvable:$true] %s30_s19 }
   0x4   :  { %p2940_p1 = scmp.lt.u32.totalorder %s2936_s22, %s3576_s1 }
   0x6   :  { %p2942_p2 = pnand %p2940_p1, %p2937_p0 }
   0x8   :  { %2945 = shalt.err (!%p2942_p2)
}
   0x9   :  { %s2946_s27 = scalar_lea.vmem %s31_s19, 6144  ;;  %p2951_p4 = scmp.lt.s32.totalorder %s31_s19, %s31_s19 }
   0xa   :  { %p2947_p3 = scmp.ne.s32.totalorder %s31_s19, %s2946_s27  ;;  %p2952_p5 = scmp.lt.s32.totalorder %s2946_s27, %s2946_s27 }
   0xc   :  { %p2953_p6 = por %p2952_p5, %p2951_p4 }
   0xe   :  { %p2954_p7 = pnand %p2953_p6, %p2947_p3 }
  0x10   :  { %2957 = shalt.err (!%p2954_p7)
}
  0x11   :  { %s3031_s28 = smov 384   ;;  %s3032_s29 = smov 24  }
  0x12   :  { %36 = dma.hbm_to_vmem [thread:$0]  %s3576_s1, 6144, %s31_s19, [#allocation7], %s3031_s28, %s3031_s28, %s3032_s29  }
  0x13   :  { %s3033_s7 = smov [#allocation3]   ;;  %s2958_s11 = scalar_lea.hbm %s3575_s0, 256 }
  0x14   :  { %s18_s8 = sshll.u32 %s3033_s7, 4  ;;  %p2959_p8 = scmp.ne.s32.totalorder %s3575_s0, %s2958_s11  ;;  %s19_s8 = int_to_ptr.vmem [resolvable:$true] %s18_s8 }
  0x15   :  { %p2962_p9 = scmp.lt.u32.totalorder %s2958_s11, %s3575_s0 }
  0x17   :  { %p2964_p10 = pnand %p2962_p9, %p2959_p8 }
  0x19   :  { %2967 = shalt.err (!%p2964_p10)
}
  0x1a   :  { %s2968_s16 = scalar_lea.vmem %s19_s8, 256  ;;  %p2973_p12 = scmp.lt.s32.totalorder %s19_s8, %s19_s8 }
  0x1b   :  { %p2969_p11 = scmp.ne.s32.totalorder %s19_s8, %s2968_s16  ;;  %p2974_p13 = scmp.lt.s32.totalorder %s2968_s16, %s2968_s16 }
  0x1d   :  { %p2975_p0 = por %p2974_p13, %p2973_p12 }
  0x1f   :  { %p2976_p1 = pnand %p2975_p0, %p2969_p11 }
  0x21   :  { %2979 = shalt.err (!%p2976_p1)
}
  0x22   :  { %s3034_s1 = smov 32   ;;  %s3035_s17 = smov 2  }
  0x23   :  { %24 = dma.hbm_to_vmem [thread:$0]  %s3575_s0, 256, %s19_s8, [#allocation4], %s3034_s1, %s3034_s1, %s3035_s17  }
  0x24   :  { %s3036_s20 = smov [#allocation8]   ;;  %s2980_s24 = scalar_lea.hbm %s3577_s2, 6144 }
  0x25   :  { %s42_s21 = sshll.u32 %s3036_s20, 4  ;;  %p2981_p2 = scmp.ne.s32.totalorder %s3577_s2, %s2980_s24  ;;  %s43_s21 = int_to_ptr.vmem [resolvable:$true] %s42_s21 }
  0x26   :  { %p2984_p3 = scmp.lt.u32.totalorder %s2980_s24, %s3577_s2 }
  0x28   :  { %p2986_p4 = pnand %p2984_p3, %p2981_p2 }
  0x2a   :  { %2989 = shalt.err (!%p2986_p4)
}
  0x2b   :  { %s2990_s6 = scalar_lea.vmem %s43_s21, 6144  ;;  %p2995_p6 = scmp.lt.s32.totalorder %s43_s21, %s43_s21 }
  0x2c   :  { %p2991_p5 = scmp.ne.s32.totalorder %s43_s21, %s2990_s6  ;;  %p2996_p7 = scmp.lt.s32.totalorder %s2990_s6, %s2990_s6 }
  0x2e   :  { %p2997_p8 = por %p2996_p7, %p2995_p6 }
  0x30   :  { %p2998_p9 = pnand %p2997_p8, %p2991_p5 }
  0x32   :  { %3001 = shalt.err (!%p2998_p9)
}
  0x33   :  { %48 = dma.hbm_to_vmem [thread:$0]  %s3577_s2, 6144, %s43_s21, [#allocation7], %s3031_s28, %s3031_s28, %s3032_s29  }
  0x34   :  { %3024 = dma.done.wait [#allocation4], 256  }
  0x35   :  { %3025 = vsyncadd [#allocation4], 4294967040 }
  0x36   :  { %3026 = dma.done.wait [#allocation7], 12288  }
  0x37   :  { %3027 = vsyncadd [#allocation7], 4294955008  ;;  %v3037_v0 = vmov 0.0   ;;  %v68_v1 = vld [vmem:[#allocation6 + $0x8] sm:$0xff]  ;;  %v71_v2 = vld [vmem:[#allocation6 + $0x20] sm:$0xff]  ;;  %v180_v31 = vlaneseq  ;;  %vm3040_vm0 = vmmov 0  }
  0x38   :  { %303 = vmatprep.mubr.f32.mxu0 %v3037_v0  ;;  %66 = vst [vmem:[#allocation2] sm:$0x3] %v3037_v0  ;;  %v69_v3 = vld [vmem:[#allocation6 + $0x10] sm:$0xff]  ;;  %v2332_v4 = vpack.c.bf16 %v71_v2, %v68_v1  ;;  %v72_v5 = vld [vmem:[#allocation6 + $0x28] sm:$0xff]  ;;  %v67_v6 = vld [vmem:[#allocation6] sm:$0xff] }
  0x39   :  { %v70_v7 = vld [vmem:[#allocation6 + $0x18] sm:$0xff]  ;;  %v2364_v8 = vpack.c.bf16 %v72_v5, %v69_v3  ;;  %v77_v11 = vld [vmem:[#allocation6 + $0x50] sm:$0xff]  ;;  %v75_v12 = vld [vmem:[#allocation6 + $0x40] sm:$0xff]  ;;  %v3038_v32 = vmov 1983009808   ;;  %v3119_v43 = vshrl.u32 %v180_v31, 7 }
  0x3a   :  { %v2334_v9 = vpack.c.bf16 %v70_v7, %v67_v6  ;;  %v74_v10 = vld [vmem:[#allocation6 + $0x38] sm:$0xff]  ;;  %2333 = vmatprep.subr.bf16.mxu0 %v2332_v4  ;;  %v73_v15 = vld [vmem:[#allocation6 + $0x30] sm:$0xff]  ;;  %v76_v16 = vld [vmem:[#allocation6 + $0x48] sm:$0xff]  ;;  %v206_v33 = vunpack.c.l.s4 %v3038_v32 }
  0x3b   :  { %v2336_v13 = vpack.c.bf16 %v77_v11, %v74_v10  ;;  %v78_v14 = vld [vmem:[#allocation6 + $0x58] sm:$0xff]  ;;  %2365 = vmatprep.subr.bf16.mxu1 %v2364_v8  ;;  %v2338_v18 = vpack.c.bf16 %v76_v16, %v73_v15  ;;  %v80_v19 = vld [vmem:[#allocation6 + $0x68] sm:$0xff]  ;;  %v83_v20 = vld [vmem:[#allocation6 + $0x80] sm:$0xff] }
  0x3c   :  { %2335 = vmatpush1.bf16.msra.mxu0 %v2334_v9  ;;  %v2368_v17 = vpack.c.bf16 %v78_v14, %v75_v12  ;;  %v81_v21 = vld [vmem:[#allocation6 + $0x70] sm:$0xff]  ;;  %2367 = vmatpush3.bf16.msra.mxu1 %v2364_v8  ;;  %v2340_v22 = vpack.c.bf16 %v83_v20, %v80_v19  ;;  %v84_v23 = vld [vmem:[#allocation6 + $0x88] sm:$0xff]  ;;  %v79_v24 = vld [vmem:[#allocation6 + $0x60] sm:$0xff]  ;;  %v207_v44 = vunpack.c.0.s8 %v206_v33 }
  0x3d   :  { %2337 = vmatprep.subr.bf16.mxu0 %v2336_v13  ;;  %v82_v25 = vld [vmem:[#allocation6 + $0x78] sm:$0xff]  ;;  %v2372_v26 = vpack.c.bf16 %v84_v23, %v81_v21  ;;  %v89_v28 = vld [vmem:[#allocation6 + $0xb0] sm:$0xff]  ;;  %v87_v29 = vld [vmem:[#allocation6 + $0xa0] sm:$0xff] }
  0x3e   :  { %2369 = vmatprep.subr.bf16.mxu1 %v2368_v17  ;;  %v86_v27 = vld [vmem:[#allocation6 + $0x98] sm:$0xff]  ;;  %v2342_v34 = vpack.c.bf16 %v82_v25, %v79_v24  ;;  %v85_v36 = vld [vmem:[#allocation6 + $0x90] sm:$0xff]  ;;  %v88_v37 = vld [vmem:[#allocation6 + $0xa8] sm:$0xff]  ;;  %v3122_v54 = vsub.s32 %v207_v44, %v3119_v43 }
  0x3f   :  { %v90_v30 = vld [vmem:[#allocation6 + $0xb8] sm:$0xff]  ;;  %v2344_v35 = vpack.c.bf16 %v89_v28, %v86_v27  ;;  %v92_v39 = vld [vmem:[#allocation6 + $0xc8] sm:$0xff]  ;;  %v95_v40 = vld [vmem:[#allocation6 + $0xe0] sm:$0xff]  ;;  %v2346_v45 = vpack.c.bf16 %v88_v37, %v85_v36 }
  0x40   :  { %2339 = vmatpush1.bf16.msra.mxu0 %v2338_v18  ;;  %2371 = vmatpush3.bf16.msra.mxu1 %v2368_v17  ;;  %v2376_v38 = vpack.c.bf16 %v90_v30, %v87_v29  ;;  %v93_v41 = vld [vmem:[#allocation6 + $0xd0] sm:$0xff]  ;;  %v96_v42 = vld [vmem:[#allocation6 + $0xe8] sm:$0xff]  ;;  %v2348_v46 = vpack.c.bf16 %v95_v40, %v92_v39  ;;  %v91_v47 = vld [vmem:[#allocation6 + $0xc0] sm:$0xff] }
  0x41   :  { %2341 = vmatprep.subr.bf16.mxu0 %v2340_v22  ;;  %2373 = vmatprep.subr.bf16.mxu1 %v2372_v26  ;;  %v94_v48 = vld [vmem:[#allocation6 + $0xd8] sm:$0xff]  ;;  %v2380_v49 = vpack.c.bf16 %v96_v42, %v93_v41  ;;  %v101_v51 = vld [vmem:[#allocation6 + $0x110] sm:$0xff]  ;;  %v99_v52 = vld [vmem:[#allocation6 + $0x100] sm:$0xff] }
  0x42   :  { %v98_v50 = vld [vmem:[#allocation6 + $0xf8] sm:$0xff]  ;;  %v2350_v55 = vpack.c.bf16 %v94_v48, %v91_v47  ;;  %v170_v56 = vld [vmem:[#allocation3] sm:$0x3]  ;;  %v171_v57 = vld [vmem:[#allocation3 + $0x2] sm:$0x3] }
  0x43   :  { %v102_v53 = vld [vmem:[#allocation6 + $0x118] sm:$0xff]  ;;  %v172_v58 = vld [vmem:[#allocation3 + $0x4] sm:$0x3]  ;;  %v2352_v59 = vpack.c.bf16 %v101_v51, %v98_v50  ;;  %v100_v61 = vld [vmem:[#allocation6 + $0x108] sm:$0xff]  ;;  %v203_v63 = vcombine.low %v170_v56, %v171_v57  ;;  %v3039_v50 = vmov 0.0|0.0  }
  0x44   :  { %2343 = vmatpush1.bf16.msra.mxu0 %v2342_v34  ;;  %2375 = vmatpush3.bf16.msra.mxu1 %v2372_v26  ;;  %v97_v60 = vld [vmem:[#allocation6 + $0xf0] sm:$0xff]  ;;  %v2384_v1 = vpack.c.bf16 %v102_v53, %v99_v52  ;;  %v104_v2 = vld [vmem:[#allocation6 + $0x128] sm:$0xff]  ;;  %v107_v3 = vld [vmem:[#allocation6 + $0x140] sm:$0xff] }
  0x45   :  { %2345 = vmatprep.subr.bf16.mxu0 %v2344_v35  ;;  %2377 = vmatprep.subr.bf16.mxu1 %v2376_v38  ;;  %v173_v62 = vld [vmem:[#allocation3 + $0x6] sm:$0x3]  ;;  %v108_v6 = vld [vmem:[#allocation6 + $0x148] sm:$0xff]  ;;  %v211_v7 = vrot.slane %v203_v63, %v3122_v54  ;;  %v2354_v8 = vpack.c.bf16 %v100_v61, %v97_v60  ;;  %v103_v9 = vld [vmem:[#allocation6 + $0x120] sm:$0xff]  ;;  %v2356_v13 = vpack.c.bf16 %v107_v3, %v104_v2 }
  0x46   :  { %v204_v4 = vcombine.low %v172_v58, %v173_v62  ;;  %v105_v5 = vld [vmem:[#allocation6 + $0x130] sm:$0xff]  ;;  %v106_v10 = vld [vmem:[#allocation6 + $0x138] sm:$0xff]  ;;  %v111_v21 = vld [vmem:[#allocation6 + $0x160] sm:$0xff] }
  0x47   :  { %v174_v12 = vld [vmem:[#allocation3 + $0x8] sm:$0x3]  ;;  %v175_v14 = vld [vmem:[#allocation3 + $0xa] sm:$0x3]  ;;  %v176_v15 = vld [vmem:[#allocation3 + $0xc] sm:$0x3]  ;;  %v2388_v17 = vpack.c.bf16 %v108_v6, %v105_v5  ;;  %v2358_v23 = vpack.c.bf16 %v106_v10, %v103_v9 }
  0x48   :  { %2347 = vmatpush1.bf16.msra.mxu0 %v2346_v45  ;;  %2379 = vmatpush3.bf16.msra.mxu1 %v2376_v38  ;;  %v218_v11 = vrot.slane %v204_v4, %v3122_v54  ;;  %v177_v16 = vld [vmem:[#allocation3 + $0xe] sm:$0x3]  ;;  %v113_v19 = vld [vmem:[#allocation6 + $0x170] sm:$0xff]  ;;  %v220_v24 = vcombine.low %v174_v12, %v175_v14  ;;  %v112_v28 = vld [vmem:[#allocation6 + $0x168] sm:$0xff] }
  0x49   :  { %2349 = vmatprep.subr.bf16.mxu0 %v2348_v46  ;;  %2381 = vmatprep.subr.bf16.mxu1 %v2380_v49  ;;  %v110_v18 = vld [vmem:[#allocation6 + $0x158] sm:$0xff]  ;;  %v221_v25 = vcombine.low %v176_v15, %v177_v16  ;;  %v109_v27 = vld [vmem:[#allocation6 + $0x150] sm:$0xff]  ;;  %v116_v30 = vld [vmem:[#allocation8 + $0x8] sm:$0xff] }
  0x4a   :  { %v219_v20 = vcombine.low %v211_v7, %v218_v11  ;;  %v114_v22 = vld [vmem:[#allocation6 + $0x178] sm:$0xff]  ;;  %v2360_v26 = vpack.c.bf16 %v113_v19, %v110_v18  ;;  %v119_v31 = vld [vmem:[#allocation8 + $0x20] sm:$0xff]  ;;  %v2362_v32 = vpack.c.bf16 %v112_v28, %v109_v27  ;;  %v228_v33 = vrot.slane %v220_v24, %v3122_v54  ;;  %v125_v39 = vld [vmem:[#allocation8 + $0x50] sm:$0xff] }
  0x4b   :  { %v2392_v29 = vpack.c.bf16 %v114_v22, %v111_v21  ;;  %v235_v34 = vrot.slane %v221_v25, %v3122_v54  ;;  %v3128_v35 = vpack.c.bf16 %v119_v31, %v116_v30  ;;  %v115_v36 = vld [vmem:[#allocation8] sm:$0xff]  ;;  %v118_v37 = vld [vmem:[#allocation8 + $0x18] sm:$0xff]  ;;  %v117_v40 = vld [vmem:[#allocation8 + $0x10] sm:$0xff] }
  0x4c   :  { %2351 = vmatpush1.bf16.msra.mxu0 %v2350_v55  ;;  %2383 = vmatpush3.bf16.msra.mxu1 %v2380_v49  ;;  %v122_v38 = vld [vmem:[#allocation8 + $0x38] sm:$0xff]  ;;  %v120_v41 = vld [vmem:[#allocation8 + $0x28] sm:$0xff]  ;;  %v3130_v44 = vpack.c.bf16 %v118_v37, %v115_v36  ;;  %v121_v46 = vld [vmem:[#allocation8 + $0x30] sm:$0xff] }
  0x4d   :  { %2353 = vmatprep.subr.bf16.mxu0 %v2352_v59  ;;  %2385 = vmatprep.subr.bf16.mxu1 %v2384_v1  ;;  %v236_v42 = vcombine.low %v228_v33, %v235_v34  ;;  %v3133_v45 = vpack.c.bf16 %v125_v39, %v122_v38  ;;  %v124_v47 = vld [vmem:[#allocation8 + $0x48] sm:$0xff]  ;;  %v131_v49 = vld [vmem:[#allocation8 + $0x80] sm:$0xff]  ;;  %v3136_v51 = vpack.c.bf16 %v120_v41, %v117_v40  ;;  %v126_v53 = vld [vmem:[#allocation8 + $0x58] sm:$0xff] }
  0x4e   :  { %2049 = vmatprep.mubr.f32.mxu1 %v219_v20  ;;  %v128_v48 = vld [vmem:[#allocation8 + $0x68] sm:$0xff]  ;;  %v123_v52 = vld [vmem:[#allocation8 + $0x40] sm:$0xff]  ;;  %v3139_v55 = vpack.c.bf16 %v124_v47, %v121_v46  ;;  %v130_v58 = vld [vmem:[#allocation8 + $0x78] sm:$0xff] }
  0x4f   :  { %v3142_v56 = vpack.c.bf16 %v131_v49, %v128_v48  ;;  %v127_v57 = vld [vmem:[#allocation8 + $0x60] sm:$0xff]  ;;  %v134_v59 = vld [vmem:[#allocation8 + $0x98] sm:$0xff]  ;;  %v137_v60 = vld [vmem:[#allocation8 + $0xb0] sm:$0xff]  ;;  %v3146_v61 = vpack.c.bf16 %v126_v53, %v123_v52  ;;  %v182_v53 = vsub.s32 0, %v3119_v43 }
  0x50   :  { %2355 = vmatpush1.bf16.msra.mxu0 %v2354_v8  ;;  %2387 = vmatpush3.bf16.msra.mxu1 %v2384_v1  ;;  %v129_v62 = vld [vmem:[#allocation8 + $0x70] sm:$0xff]  ;;  %v132_v63 = vld [vmem:[#allocation8 + $0x88] sm:$0xff]  ;;  %v3152_v1 = vpack.c.bf16 %v130_v58, %v127_v57  ;;  %v3156_v2 = vpack.c.bf16 %v137_v60, %v134_v59  ;;  %v143_v6 = vld [vmem:[#allocation8 + $0xe0] sm:$0xff]  ;;  %v186_v58 = vsub.s32 1, %v3119_v43  ;;  %v190_v59 = vsub.s32 2, %v3119_v43 }
  0x51   :  { %2357 = vmatprep.subr.bf16.mxu0 %v2356_v13  ;;  %2389 = vmatprep.subr.bf16.mxu1 %v2388_v17  ;;  %v133_v3 = vld [vmem:[#allocation8 + $0x90] sm:$0xff]  ;;  %v136_v4 = vld [vmem:[#allocation8 + $0xa8] sm:$0xff]  ;;  %v3159_v7 = vpack.c.bf16 %v132_v63, %v129_v62  ;;  %v135_v8 = vld [vmem:[#allocation8 + $0xa0] sm:$0xff] }
  0x52   :  { %v140_v5 = vld [vmem:[#allocation8 + $0xc8] sm:$0xff]  ;;  %v138_v9 = vld [vmem:[#allocation8 + $0xb8] sm:$0xff]  ;;  %v3163_v10 = vpack.c.bf16 %v136_v4, %v133_v3  ;;  %v139_v12 = vld [vmem:[#allocation8 + $0xc0] sm:$0xff] }
  0x53   :  { %v3166_v11 = vpack.c.bf16 %v143_v6, %v140_v5  ;;  %v142_v13 = vld [vmem:[#allocation8 + $0xd8] sm:$0xff]  ;;  %v149_v15 = vld [vmem:[#allocation8 + $0x110] sm:$0xff]  ;;  %v3169_v16 = vpack.c.bf16 %v138_v9, %v135_v8  ;;  %v144_v18 = vld [vmem:[#allocation8 + $0xe8] sm:$0xff] }
  0x54   :  { %2359 = vmatpush1.bf16.msra.mxu0 %v2358_v23  ;;  %2391 = vmatpush3.bf16.msra.mxu1 %v2388_v17  ;;  %v146_v14 = vld [vmem:[#allocation8 + $0xf8] sm:$0xff]  ;;  %v141_v17 = vld [vmem:[#allocation8 + $0xd0] sm:$0xff]  ;;  %v3173_v19 = vpack.c.bf16 %v142_v13, %v139_v12  ;;  %v148_v22 = vld [vmem:[#allocation8 + $0x108] sm:$0xff] }
  0x55   :  { %2361 = vmatprep.subr.bf16.mxu0 %v2360_v26  ;;  %2393 = vmatprep.subr.bf16.mxu1 %v2392_v29  ;;  %v145_v21 = vld [vmem:[#allocation8 + $0xf0] sm:$0xff]  ;;  %v152_v23 = vld [vmem:[#allocation8 + $0x128] sm:$0xff]  ;;  %v155_v24 = vld [vmem:[#allocation8 + $0x140] sm:$0xff]  ;;  %v3179_v25 = vpack.c.bf16 %v144_v18, %v141_v17 }
  0x56   :  { %v147_v26 = vld [vmem:[#allocation8 + $0x100] sm:$0xff]  ;;  %v150_v27 = vld [vmem:[#allocation8 + $0x118] sm:$0xff]  ;;  %v3183_v28 = vpack.c.bf16 %v148_v22, %v145_v21  ;;  %v161_v33 = vld [vmem:[#allocation8 + $0x170] sm:$0xff] }
  0x57   :  { %v151_v30 = vld [vmem:[#allocation8 + $0x120] sm:$0xff]  ;;  %v154_v31 = vld [vmem:[#allocation8 + $0x138] sm:$0xff]  ;;  %v3189_v34 = vpack.c.bf16 %v150_v27, %v147_v26  ;;  %v153_v36 = vld [vmem:[#allocation8 + $0x130] sm:$0xff] }
  0x58   :  { %2363 = vmatpush1.bf16.msra.mxu0 %v2362_v32  ;;  %2395 = vmatpush3.bf16.msra.mxu1 %v2392_v29  ;;  %v3186_v29 = vpack.c.bf16 %v155_v24, %v152_v23  ;;  %v158_v32 = vld [vmem:[#allocation8 + $0x158] sm:$0xff]  ;;  %v156_v37 = vld [vmem:[#allocation8 + $0x148] sm:$0xff]  ;;  %v3193_v38 = vpack.c.bf16 %v154_v31, %v151_v30  ;;  %v157_v40 = vld [vmem:[#allocation8 + $0x150] sm:$0xff] }
  0x59   :  { %2397 = vmatprep.subr.bf16.mxu0 %v3128_v35  ;;  %2428 = vmatprep.subr.bf16.mxu1 %v3039_v50  ;;  %v3196_v39 = vpack.c.bf16 %v161_v33, %v158_v32  ;;  %v160_v41 = vld [vmem:[#allocation8 + $0x168] sm:$0xff]  ;;  %v159_v46 = vld [vmem:[#allocation8 + $0x160] sm:$0xff]  ;;  %v162_v47 = vld [vmem:[#allocation8 + $0x178] sm:$0xff] }
  0x5a   :  { %v3203_v48 = vpack.c.bf16 %v160_v41, %v157_v40  ;;  %v3207_v49 = vpack.c.bf16 %v162_v47, %v159_v46  ;;  %v3211_v52 = vld [vmem:[#allocation2] sm:$0x3] }
  0x5b   :  { %304 = vmatmul.mubr.f32.vlgmr.msra.gmra.mrb[0].mxu0 %v219_v20  ;;  %2050 = vmatmul.mubr.f32.vlgmr.msra.gmra.mrb[0].mxu1 %v236_v42  ;;  %v3176_v20 = vpack.c.bf16 %v149_v15, %v146_v14  ;;  %v178_v57 = vld [vmem:[%s3578_s3] sm:$0x7] }
  0x5c   :  { %2399 = vmatpush1.bf16.msra.mxu0 %v3130_v44  ;;  %309 = vmatprep.mubr.f32.mxu0 %v3037_v0  ;;  %v183_v60 = vrot.slane %v178_v57, %v182_v53  ;;  %v187_v62 = vrot.slane %v178_v57, %v186_v58  ;;  %v191_v63 = vrot.slane %v178_v57, %v190_v59 }
  0x5d   :  { %2401 = vmatprep.subr.bf16.mxu0 %v3133_v45  ;;  %2430 = vmatpush3.bf16.msra.mxu1 %v3136_v51 }
  0x5e   :  { %2084 = vmatprep.mubr.msk.f32.mxu1 %vm3040_vm0, %v3037_v0  ;;  %2431 = vmatprep.subr.bf16.mxu1 %v3039_v50 }
  0x5f   :  { %310 = vmatmul.mubr.f32.gmra.mrb[2].mxu0 %v236_v42  ;;  %v3199_v42 = vpack.c.bf16 %v156_v37, %v153_v36 }
  0x60   :  { %2403 = vmatpush1.bf16.msra.mxu0 %v3139_v55  ;;  %540 = vmatprep.mubr.f32.mxu0 %v3037_v0 }
  0x61   :  { %2405 = vmatprep.subr.bf16.mxu0 %v3142_v56  ;;  %2433 = vmatpush3.bf16.msra.mxu1 %v3146_v61 }
  0x62   :  { %2434 = vmatprep.subr.bf16.mxu1 %v3039_v50 }
  0x64   :  { %2407 = vmatpush1.bf16.msra.mxu0 %v3152_v1 }
  0x65   :  { %2409 = vmatprep.subr.bf16.mxu0 %v3156_v2  ;;  %2436 = vmatpush3.bf16.msra.mxu1 %v3159_v7 }
  0x66   :  { %2437 = vmatprep.subr.bf16.mxu1 %v3039_v50 }
  0x68   :  { %2411 = vmatpush1.bf16.msra.mxu0 %v3163_v10 }
  0x69   :  { %2413 = vmatprep.subr.bf16.mxu0 %v3166_v11  ;;  %2439 = vmatpush3.bf16.msra.mxu1 %v3169_v16 }
  0x6a   :  { %2440 = vmatprep.subr.bf16.mxu1 %v3039_v50 }
  0x6c   :  { %2415 = vmatpush1.bf16.msra.mxu0 %v3173_v19 }
  0x6d   :  { %2417 = vmatprep.subr.bf16.mxu0 %v3176_v20  ;;  %2442 = vmatpush3.bf16.msra.mxu1 %v3179_v25 }
  0x6e   :  { %2443 = vmatprep.subr.bf16.mxu1 %v3039_v50 }
  0x70   :  { %2419 = vmatpush1.bf16.msra.mxu0 %v3183_v28 }
  0x71   :  { %2421 = vmatprep.subr.bf16.mxu0 %v3186_v29  ;;  %2445 = vmatpush3.bf16.msra.mxu1 %v3189_v34 }
  0x72   :  { %2446 = vmatprep.subr.bf16.mxu1 %v3039_v50 }
  0x74   :  { %2423 = vmatpush1.bf16.msra.mxu0 %v3193_v38 }
  0x75   :  { %2425 = vmatprep.subr.bf16.mxu0 %v3196_v39  ;;  %2448 = vmatpush3.bf16.msra.mxu1 %v3199_v42 }
  0x76   :  { %2449 = vmatprep.subr.bf16.mxu1 %v3039_v50 }
  0x78   :  { %2427 = vmatpush1.bf16.msra.mxu0 %v3203_v48 }
  0x79   :  { %2453 = vmatprep.subr.bf16.mxu0 %v3128_v35  ;;  %2451 = vmatpush3.bf16.msra.mxu1 %v3207_v49 }
  0x7a   :  { %2484 = vmatprep.subr.bf16.mxu1 %v3039_v50 }
  0x7b   :  { %541 = vmatmul.mubr.f32.vlgmr.msra.gmra.mrb[4].mxu0 %v3211_v52 }
  0x7c   :  { %2455 = vmatpush1.bf16.msra.mxu0 %v3130_v44  ;;  %708 = vmatprep.mubr.f32.mxu0 %v3037_v0 }
  0x7d   :  { %2085 = vmatmul.mubr.f32.vlgmr.msra.gmra.mrb[2].mxu1 %v3211_v52  ;;  %2457 = vmatprep.subr.bf16.mxu0 %v3133_v45 }
  0x7e   :  { %2486 = vmatpush3.bf16.msra.mxu1 %v3136_v51  ;;  %2119 = vmatprep.mubr.msk.f32.mxu1 %vm3040_vm0, %v3037_v0 }
  0x7f   :  { %2487 = vmatprep.subr.bf16.mxu1 %v3039_v50 }
  0x80   :  { %2459 = vmatpush1.bf16.msra.mxu0 %v3139_v55 }
  0x81   :  { %2461 = vmatprep.subr.bf16.mxu0 %v3142_v56 }
  0x82   :  { %2489 = vmatpush3.bf16.msra.mxu1 %v3146_v61 }
  0x83   :  { %2490 = vmatprep.subr.bf16.mxu1 %v3039_v50 }
  0x84   :  { %2463 = vmatpush1.bf16.msra.mxu0 %v3152_v1 }
  0x85   :  { %2465 = vmatprep.subr.bf16.mxu0 %v3156_v2 }
  0x86   :  { %2492 = vmatpush3.bf16.msra.mxu1 %v3159_v7 }
  0x87   :  { %2493 = vmatprep.subr.bf16.mxu1 %v3039_v50 }
  0x88   :  { %2467 = vmatpush1.bf16.msra.mxu0 %v3163_v10 }
  0x89   :  { %2469 = vmatprep.subr.bf16.mxu0 %v3166_v11 }
  0x8a   :  { %2495 = vmatpush3.bf16.msra.mxu1 %v3169_v16 }
  0x8b   :  { %2496 = vmatprep.subr.bf16.mxu1 %v3039_v50 }
  0x8c   :  { %2471 = vmatpush1.bf16.msra.mxu0 %v3173_v19 }
  0x8d   :  { %2473 = vmatprep.subr.bf16.mxu0 %v3176_v20 }
  0x8e   :  { %2498 = vmatpush3.bf16.msra.mxu1 %v3179_v25 }
  0x8f   :  { %2499 = vmatprep.subr.bf16.mxu1 %v3039_v50 }
  0x90   :  { %2475 = vmatpush1.bf16.msra.mxu0 %v3183_v28 }
  0x91   :  { %2477 = vmatprep.subr.bf16.mxu0 %v3186_v29 }
  0x92   :  { %2501 = vmatpush3.bf16.msra.mxu1 %v3189_v34 }
  0x93   :  { %2502 = vmatprep.subr.bf16.mxu1 %v3039_v50 }
  0x94   :  { %2479 = vmatpush1.bf16.msra.mxu0 %v3193_v38 }
  0x95   :  { %2481 = vmatprep.subr.bf16.mxu0 %v3196_v39 }
  0x96   :  { %2504 = vmatpush3.bf16.msra.mxu1 %v3199_v42 }
  0x97   :  { %2505 = vmatprep.subr.bf16.mxu1 %v3039_v50 }
  0x98   :  { %2483 = vmatpush1.bf16.msra.mxu0 %v3203_v48 }
  0x99   :  { %2509 = vmatprep.subr.bf16.mxu0 %v3128_v35 }
  0x9a   :  { %2507 = vmatpush3.bf16.msra.mxu1 %v3207_v49 }
  0x9b   :  { %2540 = vmatprep.subr.bf16.mxu1 %v3039_v50 }
 0x12e   :  { %v305_v3 = vpop.f32.mrb[0].mxu0  ;;  %v2051_v5 = vpop.f32.mrb[0].mxu1 }
 0x12f   :  { %v306_v4 = vadd.f32 %v305_v3, %v183_v60  ;;  %v307_v6 = vpop.f32.mrb[1].mxu0  ;;  %v388_v8 = vadd.f32 %v2051_v5, %v191_v63  ;;  %v382_v12 = vpop.f32.mrb[1].mxu1 }
 0x130   :  { %v308_v9 = vadd.f32 %v307_v6, %v187_v62  ;;  %v383_v13 = vadd.f32 %v382_v12, %v191_v63 }
 0x131   :  { %v434_v18 = vcombine.high %v388_v8, %v388_v8  ;;  %v455_v30 = vrot.slane %v388_v8, %v3122_v54 }
 0x132   :  { %v397_v14 = vcombine.low %v306_v4, %v308_v9  ;;  %v398_v15 = vcombine.high %v306_v4, %v308_v9  ;;  %v311_v17 = vpop.f32.mrb[2].mxu0  ;;  %v399_v21 = vcombine.high %v383_v13, %v383_v13  ;;  %v420_v22 = vrot.slane %v383_v13, %v3122_v54 }
 0x133   :  { %v312_v23 = vadd.f32 %v311_v17, %v183_v60  ;;  %v313_v43 = vpop.f32.mrb[3].mxu0  ;;  %v462_v40 = vrot.slane %v434_v18, %v3122_v54 }
 0x134   :  { %v406_v24 = vrot.slane %v397_v14, %v3122_v54  ;;  %v413_v26 = vrot.slane %v398_v15, %v3122_v54  ;;  %v314_v27 = vadd.f32 %v313_v43, %v187_v62  ;;  %v427_v31 = vrot.slane %v399_v21, %v3122_v54  ;;  %v3284_v15 = vld [vmem:[%s3579_s4] ss:$0 sm:$0xff]  ;;  %s3041_s4 = smov [#allocation9]  }
 0x135   :  { %s1833_s8 = sshll.u32 %s3041_s4, 4  ;;  %s1834_s8 = int_to_ptr.vmem [resolvable:$true] %s1833_s8 }
 0x136   :  { %v428_v32 = vcombine.low %v406_v24, %v420_v22  ;;  %v3264_v33 = vcombine.high %v406_v24, %v420_v22  ;;  %v432_v36 = vcombine.low %v312_v23, %v314_v27  ;;  %v433_v37 = vcombine.high %v312_v23, %v314_v27  ;;  %s3002_s9 = scalar_lea.vmem %s1834_s8, 256  ;;  %p3007_p11 = scmp.lt.s32.totalorder %s1834_s8, %s1834_s8 }
 0x137   :  { %v3267_v41 = vcombine.low %v413_v26, %v427_v31  ;;  %v3269_v46 = vcombine.high %v413_v26, %v427_v31  ;;  %p3003_p10 = scmp.ne.s32.totalorder %s1834_s8, %s3002_s9  ;;  %p3008_p12 = scmp.lt.s32.totalorder %s3002_s9, %s3002_s9 }
 0x138   :  { %v441_v47 = vrot.slane %v432_v36, %v3122_v54  ;;  %v448_v53 = vrot.slane %v433_v37, %v3122_v54  ;;  %v624_v63 = vrot.slane %v428_v32, 2  ;;  %v635_v23 = vrot.slane %v428_v32, 4 }
 0x139   :  { %v792_v37 = vrot.slane %v3264_v33, 2  ;;  %p3009_p13 = por %p3008_p12, %p3007_p11 }
 0x13a   :  { %v3273_v57 = vcombine.low %v441_v47, %v455_v30  ;;  %v3275_v58 = vcombine.high %v441_v47, %v455_v30  ;;  %v3277_v59 = vcombine.low %v448_v53, %v462_v40  ;;  %v3279_v60 = vcombine.high %v448_v53, %v462_v40 }
 0x13b   :  { %p3010_p0 = pnand %p3009_p13, %p3003_p10 }
 0x14e   :  { %v542_v62 = vpop.f32.mrb[4].mxu0 }
 0x14f   :  { %v617_v3 = vadd.f32 %v542_v62, %v428_v32  ;;  %v544_v4 = vpop.f32.mrb[5].mxu0 }
 0x150   :  { %v626_v5 = vadd.f32 %v624_v63, %v544_v4  ;;  %v613_v6 = vpop.f32.mrb[2].mxu1 }
 0x151   :  { %v1847_v8 = vmul.f32 -1.442695, %v617_v3  ;;  %v2086_v9 = vpop.f32.mrb[3].mxu1  ;;  %v633_v18 = vadd.f32 %v3284_v15, %v613_v6 }
 0x152   :  { %v1848_v12 = vmul.f32 -1.442695, %v626_v5 }
 0x153   :  { %2856 = vpow2.f32 %v1847_v8 }
 0x154   :  { %2858 = vpow2.f32 %v1848_v12 }
 0x15d   :  { %v2857_v54 = vpop.eup %2856 }
 0x15e   :  { %v621_v13 = vadd.f32 1.0, %v2857_v54  ;;  %v2859_v14 = vpop.eup %2858 }
 0x15f   :  { %v630_v17 = vadd.f32 1.0, %v2859_v14 }
 0x160   :  { %2860 = vrcp.f32 %v621_v13  ;;  %v803_v13 = vrot.slane %v3264_v33, 4 }
 0x161   :  { %2862 = vrcp.f32 %v630_v17 }
 0x16a   :  { %v2861_v21 = vpop.eup %2860 }
 0x16b   :  { %v634_v22 = vmul.f32 %v2861_v21, %v633_v18  ;;  %v2863_v24 = vpop.eup %2862 }
 0x16c   :  { %v639_v26 = vsub.f32 1.0, %v2863_v24  ;;  %v641_v31 = vmul.f32 %v2863_v24, %v3211_v52 }
 0x16d   :  { %v637_v43 = vadd.f32 %v635_v23, %v634_v22 }
 0x16f   :  { %2864 = vtanh.f32 %v637_v43 }
 0x179   :  { %v2865_v27 = vpop.eup %2864 }
 0x17a   :  { %v640_v30 = vmul.f32 %v2865_v27, %v639_v26  ;;  %v961_v26 = vrot.slane %v3267_v41, 2 }
 0x17c   :  { %v3288_v36 = vadd.f32 %v641_v31, %v640_v30 }
 0x17e   :  { %643 = vst [vmem:[#allocation9] sm:$0x3] %v3288_v36  ;;  %709 = vmatmul.mubr.f32.vlgmr.msra.gmra.mrb[6].mxu0 %v3288_v36  ;;  %2120 = vmatmul.mubr.f32.vlgmr.msra.gmra.mrb[4].mxu1 %v3288_v36 }
 0x17f   :  { %2511 = vmatpush1.bf16.msra.mxu0 %v3130_v44  ;;  %2542 = vmatpush3.bf16.msra.mxu1 %v3136_v51 }
 0x180   :  { %2513 = vmatprep.subr.bf16.mxu0 %v3133_v45  ;;  %2543 = vmatprep.subr.bf16.mxu1 %v3039_v50 }
 0x181   :  { %877 = vmatprep.mubr.f32.mxu0 %v3037_v0  ;;  %2154 = vmatprep.mubr.msk.f32.mxu1 %vm3040_vm0, %v3037_v0 }
 0x183   :  { %2515 = vmatpush1.bf16.msra.mxu0 %v3139_v55  ;;  %2545 = vmatpush3.bf16.msra.mxu1 %v3146_v61 }
 0x184   :  { %2517 = vmatprep.subr.bf16.mxu0 %v3142_v56  ;;  %2546 = vmatprep.subr.bf16.mxu1 %v3039_v50 }
 0x187   :  { %2519 = vmatpush1.bf16.msra.mxu0 %v3152_v1  ;;  %2548 = vmatpush3.bf16.msra.mxu1 %v3159_v7 }
 0x188   :  { %2521 = vmatprep.subr.bf16.mxu0 %v3156_v2  ;;  %2549 = vmatprep.subr.bf16.mxu1 %v3039_v50 }
 0x18b   :  { %2523 = vmatpush1.bf16.msra.mxu0 %v3163_v10  ;;  %2551 = vmatpush3.bf16.msra.mxu1 %v3169_v16 }
 0x18c   :  { %2525 = vmatprep.subr.bf16.mxu0 %v3166_v11  ;;  %2552 = vmatprep.subr.bf16.mxu1 %v3039_v50 }
 0x18f   :  { %2527 = vmatpush1.bf16.msra.mxu0 %v3173_v19  ;;  %2554 = vmatpush3.bf16.msra.mxu1 %v3179_v25 }
 0x190   :  { %2529 = vmatprep.subr.bf16.mxu0 %v3176_v20  ;;  %2555 = vmatprep.subr.bf16.mxu1 %v3039_v50 }
 0x193   :  { %2531 = vmatpush1.bf16.msra.mxu0 %v3183_v28  ;;  %2557 = vmatpush3.bf16.msra.mxu1 %v3189_v34 }
 0x194   :  { %2533 = vmatprep.subr.bf16.mxu0 %v3186_v29  ;;  %2558 = vmatprep.subr.bf16.mxu1 %v3039_v50 }
 0x197   :  { %2535 = vmatpush1.bf16.msra.mxu0 %v3193_v38  ;;  %2560 = vmatpush3.bf16.msra.mxu1 %v3199_v42 }
 0x198   :  { %2537 = vmatprep.subr.bf16.mxu0 %v3196_v39  ;;  %2561 = vmatprep.subr.bf16.mxu1 %v3039_v50 }
 0x19b   :  { %2539 = vmatpush1.bf16.msra.mxu0 %v3203_v48  ;;  %2563 = vmatpush3.bf16.msra.mxu1 %v3207_v49 }
 0x19c   :  { %2565 = vmatprep.subr.bf16.mxu0 %v3128_v35  ;;  %2596 = vmatprep.subr.bf16.mxu1 %v3039_v50 }
 0x251   :  { %v710_v52 = vpop.f32.mrb[6].mxu0  ;;  %v781_v32 = vpop.f32.mrb[4].mxu1 }
 0x252   :  { %v785_v40 = vadd.f32 %v710_v52, %v3264_v33  ;;  %v712_v47 = vpop.f32.mrb[7].mxu0  ;;  %v2121_v53 = vpop.f32.mrb[5].mxu1  ;;  %v801_v9 = vadd.f32 %v3284_v15, %v781_v32 }
 0x253   :  { %v794_v62 = vadd.f32 %v792_v37, %v712_v47 }
 0x254   :  { %v1849_v63 = vmul.f32 -1.442695, %v785_v40 }
 0x255   :  { %v1850_v3 = vmul.f32 -1.442695, %v794_v62 }
 0x256   :  { %2866 = vpow2.f32 %v1849_v63 }
 0x257   :  { %2868 = vpow2.f32 %v1850_v3 }
 0x260   :  { %v2867_v4 = vpop.eup %2866 }
 0x261   :  { %v789_v5 = vadd.f32 1.0, %v2867_v4  ;;  %v2869_v6 = vpop.eup %2868  ;;  %v972_v4 = vrot.slane %v3267_v41, 4 }
 0x262   :  { %v798_v8 = vadd.f32 1.0, %v2869_v6 }
 0x263   :  { %2870 = vrcp.f32 %v789_v5 }
 0x264   :  { %2872 = vrcp.f32 %v798_v8 }
 0x26d   :  { %v2871_v12 = vpop.eup %2870 }
 0x26e   :  { %v802_v54 = vmul.f32 %v2871_v12, %v801_v9  ;;  %v2873_v17 = vpop.eup %2872 }
 0x26f   :  { %v807_v18 = vsub.f32 1.0, %v2873_v17  ;;  %v809_v23 = vmul.f32 %v2873_v17, %v3288_v36  ;;  %v1130_v17 = vrot.slane %v3269_v46, 2 }
 0x270   :  { %v805_v14 = vadd.f32 %v803_v13, %v802_v54 }
 0x272   :  { %2874 = vtanh.f32 %v805_v14 }
 0x27c   :  { %v2875_v21 = vpop.eup %2874 }
 0x27d   :  { %v808_v22 = vmul.f32 %v2875_v21, %v807_v18 }
 0x27f   :  { %v3333_v43 = vadd.f32 %v809_v23, %v808_v22 }
 0x281   :  { %812 = vst [vmem:[#allocation9 + $0x2] sm:$0x3] %v3333_v43  ;;  %878 = vmatmul.mubr.f32.vlgmr.msra.gmra.mrb[8].mxu0 %v3333_v43  ;;  %2155 = vmatmul.mubr.f32.vlgmr.msra.gmra.mrb[6].mxu1 %v3333_v43 }
 0x282   :  { %2567 = vmatpush1.bf16.msra.mxu0 %v3130_v44  ;;  %2598 = vmatpush3.bf16.msra.mxu1 %v3136_v51 }
 0x283   :  { %2569 = vmatprep.subr.bf16.mxu0 %v3133_v45  ;;  %2599 = vmatprep.subr.bf16.mxu1 %v3039_v50 }
 0x284   :  { %1046 = vmatprep.mubr.f32.mxu0 %v3037_v0  ;;  %2189 = vmatprep.mubr.msk.f32.mxu1 %vm3040_vm0, %v3037_v0 }
 0x286   :  { %2571 = vmatpush1.bf16.msra.mxu0 %v3139_v55  ;;  %2601 = vmatpush3.bf16.msra.mxu1 %v3146_v61 }
 0x287   :  { %2573 = vmatprep.subr.bf16.mxu0 %v3142_v56  ;;  %2602 = vmatprep.subr.bf16.mxu1 %v3039_v50 }
 0x28a   :  { %2575 = vmatpush1.bf16.msra.mxu0 %v3152_v1  ;;  %2604 = vmatpush3.bf16.msra.mxu1 %v3159_v7 }
 0x28b   :  { %2577 = vmatprep.subr.bf16.mxu0 %v3156_v2  ;;  %2605 = vmatprep.subr.bf16.mxu1 %v3039_v50 }
 0x28e   :  { %2579 = vmatpush1.bf16.msra.mxu0 %v3163_v10  ;;  %2607 = vmatpush3.bf16.msra.mxu1 %v3169_v16 }
 0x28f   :  { %2581 = vmatprep.subr.bf16.mxu0 %v3166_v11  ;;  %2608 = vmatprep.subr.bf16.mxu1 %v3039_v50 }
 0x292   :  { %2583 = vmatpush1.bf16.msra.mxu0 %v3173_v19  ;;  %2610 = vmatpush3.bf16.msra.mxu1 %v3179_v25 }
 0x293   :  { %2585 = vmatprep.subr.bf16.mxu0 %v3176_v20  ;;  %2611 = vmatprep.subr.bf16.mxu1 %v3039_v50 }
 0x296   :  { %2587 = vmatpush1.bf16.msra.mxu0 %v3183_v28  ;;  %2613 = vmatpush3.bf16.msra.mxu1 %v3189_v34 }
 0x297   :  { %2589 = vmatprep.subr.bf16.mxu0 %v3186_v29  ;;  %2614 = vmatprep.subr.bf16.mxu1 %v3039_v50 }
 0x29a   :  { %2591 = vmatpush1.bf16.msra.mxu0 %v3193_v38  ;;  %2616 = vmatpush3.bf16.msra.mxu1 %v3199_v42 }
 0x29b   :  { %2593 = vmatprep.subr.bf16.mxu0 %v3196_v39  ;;  %2617 = vmatprep.subr.bf16.mxu1 %v3039_v50 }
 0x29e   :  { %2595 = vmatpush1.bf16.msra.mxu0 %v3203_v48  ;;  %2619 = vmatpush3.bf16.msra.mxu1 %v3207_v49 }
 0x29f   :  { %2621 = vmatprep.subr.bf16.mxu0 %v3128_v35  ;;  %2652 = vmatprep.subr.bf16.mxu1 %v3039_v50 }
 0x354   :  { %v879_v33 = vpop.f32.mrb[8].mxu0  ;;  %v950_v24 = vpop.f32.mrb[6].mxu1 }
 0x355   :  { %v954_v27 = vadd.f32 %v879_v33, %v3267_v41  ;;  %v881_v30 = vpop.f32.mrb[9].mxu0  ;;  %v2156_v31 = vpop.f32.mrb[7].mxu1  ;;  %v970_v62 = vadd.f32 %v3284_v15, %v950_v24 }
 0x356   :  { %v963_v36 = vadd.f32 %v961_v26, %v881_v30 }
 0x357   :  { %v1851_v52 = vmul.f32 -1.442695, %v954_v27 }
 0x358   :  { %v1852_v32 = vmul.f32 -1.442695, %v963_v36 }
 0x359   :  { %2876 = vpow2.f32 %v1851_v52 }
 0x35a   :  { %2878 = vpow2.f32 %v1852_v32  ;;  %v1141_v32 = vrot.slane %v3269_v46, 4 }
 0x363   :  { %v2877_v37 = vpop.eup %2876 }
 0x364   :  { %v958_v40 = vadd.f32 1.0, %v2877_v37  ;;  %v2879_v47 = vpop.eup %2878 }
 0x365   :  { %v967_v53 = vadd.f32 1.0, %v2879_v47 }
 0x366   :  { %2880 = vrcp.f32 %v958_v40 }
 0x367   :  { %2882 = vrcp.f32 %v967_v53 }
 0x370   :  { %v2881_v63 = vpop.eup %2880 }
 0x371   :  { %v971_v3 = vmul.f32 %v2881_v63, %v970_v62  ;;  %v2883_v6 = vpop.eup %2882 }
 0x372   :  { %v976_v8 = vsub.f32 1.0, %v2883_v6  ;;  %v978_v54 = vmul.f32 %v2883_v6, %v3333_v43 }
 0x373   :  { %v974_v5 = vadd.f32 %v972_v4, %v971_v3 }
 0x375   :  { %2884 = vtanh.f32 %v974_v5  ;;  %v1299_v5 = vrot.slane %v3273_v57, 2 }
 0x37f   :  { %v2885_v9 = vpop.eup %2884 }
 0x380   :  { %v977_v12 = vmul.f32 %v2885_v9, %v976_v8 }
 0x382   :  { %v3378_v13 = vadd.f32 %v978_v54, %v977_v12 }
 0x384   :  { %981 = vst [vmem:[#allocation9 + $0x4] sm:$0x3] %v3378_v13  ;;  %1047 = vmatmul.mubr.f32.vlgmr.msra.gmra.mrb[10].mxu0 %v3378_v13  ;;  %2190 = vmatmul.mubr.f32.vlgmr.msra.gmra.mrb[8].mxu1 %v3378_v13 }
 0x385   :  { %2623 = vmatpush1.bf16.msra.mxu0 %v3130_v44  ;;  %2654 = vmatpush3.bf16.msra.mxu1 %v3136_v51 }
 0x386   :  { %2625 = vmatprep.subr.bf16.mxu0 %v3133_v45  ;;  %2655 = vmatprep.subr.bf16.mxu1 %v3039_v50 }
 0x387   :  { %1215 = vmatprep.mubr.f32.mxu0 %v3037_v0  ;;  %2224 = vmatprep.mubr.msk.f32.mxu1 %vm3040_vm0, %v3037_v0 }
 0x389   :  { %2627 = vmatpush1.bf16.msra.mxu0 %v3139_v55  ;;  %2657 = vmatpush3.bf16.msra.mxu1 %v3146_v61 }
 0x38a   :  { %2629 = vmatprep.subr.bf16.mxu0 %v3142_v56  ;;  %2658 = vmatprep.subr.bf16.mxu1 %v3039_v50 }
 0x38d   :  { %2631 = vmatpush1.bf16.msra.mxu0 %v3152_v1  ;;  %2660 = vmatpush3.bf16.msra.mxu1 %v3159_v7 }
 0x38e   :  { %2633 = vmatprep.subr.bf16.mxu0 %v3156_v2  ;;  %2661 = vmatprep.subr.bf16.mxu1 %v3039_v50 }
 0x391   :  { %2635 = vmatpush1.bf16.msra.mxu0 %v3163_v10  ;;  %2663 = vmatpush3.bf16.msra.mxu1 %v3169_v16 }
 0x392   :  { %2637 = vmatprep.subr.bf16.mxu0 %v3166_v11  ;;  %2664 = vmatprep.subr.bf16.mxu1 %v3039_v50 }
 0x395   :  { %2639 = vmatpush1.bf16.msra.mxu0 %v3173_v19  ;;  %2666 = vmatpush3.bf16.msra.mxu1 %v3179_v25 }
 0x396   :  { %2641 = vmatprep.subr.bf16.mxu0 %v3176_v20  ;;  %2667 = vmatprep.subr.bf16.mxu1 %v3039_v50 }
 0x399   :  { %2643 = vmatpush1.bf16.msra.mxu0 %v3183_v28  ;;  %2669 = vmatpush3.bf16.msra.mxu1 %v3189_v34 }
 0x39a   :  { %2645 = vmatprep.subr.bf16.mxu0 %v3186_v29  ;;  %2670 = vmatprep.subr.bf16.mxu1 %v3039_v50 }
 0x39d   :  { %2647 = vmatpush1.bf16.msra.mxu0 %v3193_v38  ;;  %2672 = vmatpush3.bf16.msra.mxu1 %v3199_v42 }
 0x39e   :  { %2649 = vmatprep.subr.bf16.mxu0 %v3196_v39  ;;  %2673 = vmatprep.subr.bf16.mxu1 %v3039_v50 }
 0x3a1   :  { %2651 = vmatpush1.bf16.msra.mxu0 %v3203_v48  ;;  %2675 = vmatpush3.bf16.msra.mxu1 %v3207_v49 }
 0x3a2   :  { %2677 = vmatprep.subr.bf16.mxu0 %v3128_v35  ;;  %2708 = vmatprep.subr.bf16.mxu1 %v3039_v50 }
 0x457   :  { %v1048_v41 = vpop.f32.mrb[10].mxu0  ;;  %v1119_v14 = vpop.f32.mrb[8].mxu1 }
 0x458   :  { %v1123_v18 = vadd.f32 %v1048_v41, %v3269_v46  ;;  %v1050_v21 = vpop.f32.mrb[11].mxu0  ;;  %v2191_v22 = vpop.f32.mrb[9].mxu1  ;;  %v1139_v31 = vadd.f32 %v3284_v15, %v1119_v14 }
 0x459   :  { %v1132_v23 = vadd.f32 %v1130_v17, %v1050_v21 }
 0x45a   :  { %v1853_v43 = vmul.f32 -1.442695, %v1123_v18 }
 0x45b   :  { %v1854_v33 = vmul.f32 -1.442695, %v1132_v23 }
 0x45c   :  { %2886 = vpow2.f32 %v1853_v43  ;;  %v1310_v43 = vrot.slane %v3273_v57, 4 }
 0x45d   :  { %2888 = vpow2.f32 %v1854_v33 }
 0x466   :  { %v2887_v24 = vpop.eup %2886 }
 0x467   :  { %v1127_v26 = vadd.f32 1.0, %v2887_v24  ;;  %v2889_v27 = vpop.eup %2888 }
 0x468   :  { %v1136_v30 = vadd.f32 1.0, %v2889_v27 }
 0x469   :  { %2890 = vrcp.f32 %v1127_v26 }
 0x46a   :  { %2892 = vrcp.f32 %v1136_v30 }
 0x473   :  { %v2891_v36 = vpop.eup %2890 }
 0x474   :  { %v1140_v52 = vmul.f32 %v2891_v36, %v1139_v31  ;;  %v2893_v40 = vpop.eup %2892 }
 0x475   :  { %v1145_v47 = vsub.f32 1.0, %v2893_v40  ;;  %v1147_v63 = vmul.f32 %v2893_v40, %v3378_v13 }
 0x476   :  { %v1143_v37 = vadd.f32 %v1141_v32, %v1140_v52  ;;  %v1468_v32 = vrot.slane %v3275_v58, 2 }
 0x478   :  { %2894 = vtanh.f32 %v1143_v37 }
 0x482   :  { %v2895_v53 = vpop.eup %2894 }
 0x483   :  { %v1146_v62 = vmul.f32 %v2895_v53, %v1145_v47 }
 0x485   :  { %v3423_v3 = vadd.f32 %v1147_v63, %v1146_v62 }
 0x487   :  { %1150 = vst [vmem:[#allocation9 + $0x6] sm:$0x3] %v3423_v3  ;;  %1216 = vmatmul.mubr.f32.vlgmr.msra.gmra.mrb[12].mxu0 %v3423_v3  ;;  %2225 = vmatmul.mubr.f32.vlgmr.msra.gmra.mrb[10].mxu1 %v3423_v3 }
 0x488   :  { %2679 = vmatpush1.bf16.msra.mxu0 %v3130_v44  ;;  %2710 = vmatpush3.bf16.msra.mxu1 %v3136_v51 }
 0x489   :  { %2681 = vmatprep.subr.bf16.mxu0 %v3133_v45  ;;  %2711 = vmatprep.subr.bf16.mxu1 %v3039_v50 }
 0x48a   :  { %1384 = vmatprep.mubr.f32.mxu0 %v3037_v0  ;;  %2259 = vmatprep.mubr.msk.f32.mxu1 %vm3040_vm0, %v3037_v0 }
 0x48c   :  { %2683 = vmatpush1.bf16.msra.mxu0 %v3139_v55  ;;  %2713 = vmatpush3.bf16.msra.mxu1 %v3146_v61 }
 0x48d   :  { %2685 = vmatprep.subr.bf16.mxu0 %v3142_v56  ;;  %2714 = vmatprep.subr.bf16.mxu1 %v3039_v50 }
 0x490   :  { %2687 = vmatpush1.bf16.msra.mxu0 %v3152_v1  ;;  %2716 = vmatpush3.bf16.msra.mxu1 %v3159_v7 }
 0x491   :  { %2689 = vmatprep.subr.bf16.mxu0 %v3156_v2  ;;  %2717 = vmatprep.subr.bf16.mxu1 %v3039_v50 }
 0x494   :  { %2691 = vmatpush1.bf16.msra.mxu0 %v3163_v10  ;;  %2719 = vmatpush3.bf16.msra.mxu1 %v3169_v16 }
 0x495   :  { %2693 = vmatprep.subr.bf16.mxu0 %v3166_v11  ;;  %2720 = vmatprep.subr.bf16.mxu1 %v3039_v50 }
 0x498   :  { %2695 = vmatpush1.bf16.msra.mxu0 %v3173_v19  ;;  %2722 = vmatpush3.bf16.msra.mxu1 %v3179_v25 }
 0x499   :  { %2697 = vmatprep.subr.bf16.mxu0 %v3176_v20  ;;  %2723 = vmatprep.subr.bf16.mxu1 %v3039_v50 }
 0x49c   :  { %2699 = vmatpush1.bf16.msra.mxu0 %v3183_v28  ;;  %2725 = vmatpush3.bf16.msra.mxu1 %v3189_v34 }
 0x49d   :  { %2701 = vmatprep.subr.bf16.mxu0 %v3186_v29  ;;  %2726 = vmatprep.subr.bf16.mxu1 %v3039_v50 }
 0x4a0   :  { %2703 = vmatpush1.bf16.msra.mxu0 %v3193_v38  ;;  %2728 = vmatpush3.bf16.msra.mxu1 %v3199_v42 }
 0x4a1   :  { %2705 = vmatprep.subr.bf16.mxu0 %v3196_v39  ;;  %2729 = vmatprep.subr.bf16.mxu1 %v3039_v50 }
 0x4a4   :  { %2707 = vmatpush1.bf16.msra.mxu0 %v3203_v48  ;;  %2731 = vmatpush3.bf16.msra.mxu1 %v3207_v49 }
 0x4a5   :  { %2733 = vmatprep.subr.bf16.mxu0 %v3128_v35  ;;  %2764 = vmatprep.subr.bf16.mxu1 %v3039_v50 }
 0x55a   :  { %v1217_v46 = vpop.f32.mrb[12].mxu0  ;;  %v1288_v4 = vpop.f32.mrb[10].mxu1 }
 0x55b   :  { %v1292_v6 = vadd.f32 %v1217_v46, %v3273_v57  ;;  %v1219_v8 = vpop.f32.mrb[13].mxu0  ;;  %v2226_v9 = vpop.f32.mrb[11].mxu1  ;;  %v1308_v21 = vadd.f32 %v3284_v15, %v1288_v4 }
 0x55c   :  { %v1301_v12 = vadd.f32 %v1299_v5, %v1219_v8  ;;  %v1479_v9 = vrot.slane %v3275_v58, 4 }
 0x55d   :  { %v1855_v54 = vmul.f32 -1.442695, %v1292_v6 }
 0x55e   :  { %v1856_v13 = vmul.f32 -1.442695, %v1301_v12 }
 0x55f   :  { %2896 = vpow2.f32 %v1855_v54 }
 0x560   :  { %2898 = vpow2.f32 %v1856_v13 }
 0x569   :  { %v2897_v41 = vpop.eup %2896 }
 0x56a   :  { %v1296_v14 = vadd.f32 1.0, %v2897_v41  ;;  %v2899_v17 = vpop.eup %2898 }
 0x56b   :  { %v1305_v18 = vadd.f32 1.0, %v2899_v17 }
 0x56c   :  { %2900 = vrcp.f32 %v1296_v14 }
 0x56d   :  { %2902 = vrcp.f32 %v1305_v18 }
 0x576   :  { %v2901_v22 = vpop.eup %2900 }
 0x577   :  { %v1309_v23 = vmul.f32 %v2901_v22, %v1308_v21  ;;  %v2903_v24 = vpop.eup %2902  ;;  %v1806_v21 = vrot.slane %v3279_v60, 2 }
 0x578   :  { %v1314_v26 = vsub.f32 1.0, %v2903_v24  ;;  %v1316_v31 = vmul.f32 %v2903_v24, %v3423_v3 }
 0x579   :  { %v1312_v33 = vadd.f32 %v1310_v43, %v1309_v23 }
 0x57b   :  { %2904 = vtanh.f32 %v1312_v33 }
 0x585   :  { %v2905_v27 = vpop.eup %2904 }
 0x586   :  { %v1315_v30 = vmul.f32 %v2905_v27, %v1314_v26 }
 0x588   :  { %v3468_v36 = vadd.f32 %v1316_v31, %v1315_v30 }
 0x58a   :  { %1319 = vst [vmem:[#allocation9 + $0x8] sm:$0x3] %v3468_v36  ;;  %1385 = vmatmul.mubr.f32.vlgmr.msra.gmra.mrb[14].mxu0 %v3468_v36  ;;  %2260 = vmatmul.mubr.f32.vlgmr.msra.gmra.mrb[12].mxu1 %v3468_v36 }
 0x58b   :  { %2735 = vmatpush1.bf16.msra.mxu0 %v3130_v44  ;;  %2766 = vmatpush3.bf16.msra.mxu1 %v3136_v51 }
 0x58c   :  { %2737 = vmatprep.subr.bf16.mxu0 %v3133_v45  ;;  %2767 = vmatprep.subr.bf16.mxu1 %v3039_v50 }
 0x58d   :  { %1553 = vmatprep.mubr.f32.mxu0 %v3037_v0  ;;  %2294 = vmatprep.mubr.msk.f32.mxu1 %vm3040_vm0, %v3037_v0 }
 0x58f   :  { %2739 = vmatpush1.bf16.msra.mxu0 %v3139_v55  ;;  %2769 = vmatpush3.bf16.msra.mxu1 %v3146_v61 }
 0x590   :  { %2741 = vmatprep.subr.bf16.mxu0 %v3142_v56  ;;  %2770 = vmatprep.subr.bf16.mxu1 %v3039_v50 }
 0x593   :  { %2743 = vmatpush1.bf16.msra.mxu0 %v3152_v1  ;;  %2772 = vmatpush3.bf16.msra.mxu1 %v3159_v7 }
 0x594   :  { %2745 = vmatprep.subr.bf16.mxu0 %v3156_v2  ;;  %2773 = vmatprep.subr.bf16.mxu1 %v3039_v50 }
 0x597   :  { %2747 = vmatpush1.bf16.msra.mxu0 %v3163_v10  ;;  %2775 = vmatpush3.bf16.msra.mxu1 %v3169_v16 }
 0x598   :  { %2749 = vmatprep.subr.bf16.mxu0 %v3166_v11  ;;  %2776 = vmatprep.subr.bf16.mxu1 %v3039_v50 }
 0x59b   :  { %2751 = vmatpush1.bf16.msra.mxu0 %v3173_v19  ;;  %2778 = vmatpush3.bf16.msra.mxu1 %v3179_v25 }
 0x59c   :  { %2753 = vmatprep.subr.bf16.mxu0 %v3176_v20  ;;  %2779 = vmatprep.subr.bf16.mxu1 %v3039_v50 }
 0x59f   :  { %2755 = vmatpush1.bf16.msra.mxu0 %v3183_v28  ;;  %2781 = vmatpush3.bf16.msra.mxu1 %v3189_v34 }
 0x5a0   :  { %2757 = vmatprep.subr.bf16.mxu0 %v3186_v29  ;;  %2782 = vmatprep.subr.bf16.mxu1 %v3039_v50 }
 0x5a3   :  { %2759 = vmatpush1.bf16.msra.mxu0 %v3193_v38  ;;  %2784 = vmatpush3.bf16.msra.mxu1 %v3199_v42 }
 0x5a4   :  { %2761 = vmatprep.subr.bf16.mxu0 %v3196_v39  ;;  %2785 = vmatprep.subr.bf16.mxu1 %v3039_v50 }
 0x5a7   :  { %2763 = vmatpush1.bf16.msra.mxu0 %v3203_v48  ;;  %2787 = vmatpush3.bf16.msra.mxu1 %v3207_v49 }
 0x5a8   :  { %2789 = vmatprep.subr.bf16.mxu0 %v3128_v35  ;;  %2820 = vmatprep.subr.bf16.mxu1 %v3039_v50 }
 0x65d   :  { %v1386_v57 = vpop.f32.mrb[14].mxu0  ;;  %v1457_v52 = vpop.f32.mrb[12].mxu1 }
 0x65e   :  { %v1461_v37 = vadd.f32 %v1386_v57, %v3275_v58  ;;  %v1388_v40 = vpop.f32.mrb[15].mxu0  ;;  %v2261_v47 = vpop.f32.mrb[13].mxu1  ;;  %v1477_v5 = vadd.f32 %v3284_v15, %v1457_v52 }
 0x65f   :  { %v1470_v53 = vadd.f32 %v1468_v32, %v1388_v40  ;;  %v1817_v32 = vrot.slane %v3279_v60, 4 }
 0x660   :  { %v1857_v62 = vmul.f32 -1.442695, %v1461_v37 }
 0x661   :  { %v1858_v63 = vmul.f32 -1.442695, %v1470_v53 }
 0x662   :  { %2906 = vpow2.f32 %v1857_v62 }
 0x663   :  { %2908 = vpow2.f32 %v1858_v63 }
 0x66c   :  { %v2907_v3 = vpop.eup %2906 }
 0x66d   :  { %v1465_v46 = vadd.f32 1.0, %v2907_v3  ;;  %v2909_v4 = vpop.eup %2908 }
 0x66e   :  { %v1474_v35 = vadd.f32 1.0, %v2909_v4 }
 0x66f   :  { %2910 = vrcp.f32 %v1465_v46 }
 0x670   :  { %2912 = vrcp.f32 %v1474_v35 }
 0x679   :  { %v2911_v6 = vpop.eup %2910 }
 0x67a   :  { %v1478_v8 = vmul.f32 %v2911_v6, %v1477_v5  ;;  %v2913_v54 = vpop.eup %2912 }
 0x67b   :  { %v1483_v13 = vsub.f32 1.0, %v2913_v54  ;;  %v1485_v17 = vmul.f32 %v2913_v54, %v3468_v36 }
 0x67c   :  { %v1481_v12 = vadd.f32 %v1479_v9, %v1478_v8 }
 0x67e   :  { %2914 = vtanh.f32 %v1481_v12 }
 0x688   :  { %v2915_v41 = vpop.eup %2914 }
 0x689   :  { %v1484_v14 = vmul.f32 %v2915_v41, %v1483_v13 }
 0x68b   :  { %v3513_v18 = vadd.f32 %v1485_v17, %v1484_v14 }
 0x68d   :  { %1488 = vst [vmem:[#allocation9 + $0xa] sm:$0x3] %v3513_v18  ;;  %1554 = vmatmul.mubr.f32.vlgmr.msra.gmra.mrb[16].mxu0 %v3513_v18  ;;  %2295 = vmatmul.mubr.f32.vlgmr.msra.gmra.mrb[14].mxu1 %v3513_v18 }
 0x68e   :  { %2791 = vmatpush1.bf16.msra.mxu0 %v3130_v44  ;;  %2822 = vmatpush3.bf16.msra.mxu1 %v3136_v51 }
 0x68f   :  { %2793 = vmatprep.subr.bf16.mxu0 %v3133_v45  ;;  %2823 = vmatprep.subr.bf16.mxu1 %v3039_v50  ;;  %v1637_v45 = vrot.slane %v3277_v59, 2 }
 0x690   :  { %1722 = vmatprep.mubr.f32.mxu0 %v3037_v0  ;;  %2329 = vmatprep.mubr.msk.f32.mxu1 %vm3040_vm0, %v3037_v0 }
 0x692   :  { %2795 = vmatpush1.bf16.msra.mxu0 %v3139_v55  ;;  %2825 = vmatpush3.bf16.msra.mxu1 %v3146_v61 }
 0x693   :  { %2797 = vmatprep.subr.bf16.mxu0 %v3142_v56  ;;  %2826 = vmatprep.subr.bf16.mxu1 %v3039_v50 }
 0x696   :  { %2799 = vmatpush1.bf16.msra.mxu0 %v3152_v1  ;;  %2828 = vmatpush3.bf16.msra.mxu1 %v3159_v7 }
 0x697   :  { %2801 = vmatprep.subr.bf16.mxu0 %v3156_v2  ;;  %2829 = vmatprep.subr.bf16.mxu1 %v3039_v50 }
 0x69a   :  { %2803 = vmatpush1.bf16.msra.mxu0 %v3163_v10  ;;  %2831 = vmatpush3.bf16.msra.mxu1 %v3169_v16 }
 0x69b   :  { %2805 = vmatprep.subr.bf16.mxu0 %v3166_v11  ;;  %2832 = vmatprep.subr.bf16.mxu1 %v3039_v50 }
 0x69e   :  { %2807 = vmatpush1.bf16.msra.mxu0 %v3173_v19  ;;  %2834 = vmatpush3.bf16.msra.mxu1 %v3179_v25  ;;  %v1648_v25 = vrot.slane %v3277_v59, 4 }
 0x69f   :  { %2809 = vmatprep.subr.bf16.mxu0 %v3176_v20  ;;  %2835 = vmatprep.subr.bf16.mxu1 %v3039_v50 }
 0x6a2   :  { %2811 = vmatpush1.bf16.msra.mxu0 %v3183_v28  ;;  %2837 = vmatpush3.bf16.msra.mxu1 %v3189_v34 }
 0x6a3   :  { %2813 = vmatprep.subr.bf16.mxu0 %v3186_v29  ;;  %2838 = vmatprep.subr.bf16.mxu1 %v3039_v50 }
 0x6a6   :  { %2815 = vmatpush1.bf16.msra.mxu0 %v3193_v38  ;;  %2840 = vmatpush3.bf16.msra.mxu1 %v3199_v42 }
 0x6a7   :  { %2817 = vmatprep.subr.bf16.mxu0 %v3196_v39  ;;  %2841 = vmatprep.subr.bf16.mxu1 %v3039_v50 }
 0x6aa   :  { %2819 = vmatpush1.bf16.msra.mxu0 %v3203_v48  ;;  %2843 = vmatpush3.bf16.msra.mxu1 %v3207_v49 }
 0x760   :  { %v1555_v0 = vpop.f32.mrb[16].mxu0  ;;  %v1626_v44 = vpop.f32.mrb[14].mxu1 }
 0x761   :  { %v1630_v51 = vadd.f32 %v1555_v0, %v3277_v59  ;;  %v1557_v55 = vpop.f32.mrb[17].mxu0  ;;  %v2296_v56 = vpop.f32.mrb[15].mxu1  ;;  %v1646_v16 = vadd.f32 %v3284_v15, %v1626_v44 }
 0x762   :  { %v1639_v61 = vadd.f32 %v1637_v45, %v1557_v55 }
 0x763   :  { %v1859_v1 = vmul.f32 -1.442695, %v1630_v51 }
 0x764   :  { %v1860_v2 = vmul.f32 -1.442695, %v1639_v61 }
 0x765   :  { %2916 = vpow2.f32 %v1859_v1 }
 0x766   :  { %2918 = vpow2.f32 %v1860_v2 }
 0x76f   :  { %v2917_v7 = vpop.eup %2916 }
 0x770   :  { %v1634_v10 = vadd.f32 1.0, %v2917_v7  ;;  %v2919_v50 = vpop.eup %2918 }
 0x771   :  { %v1643_v11 = vadd.f32 1.0, %v2919_v50 }
 0x772   :  { %2920 = vrcp.f32 %v1634_v10 }
 0x773   :  { %2922 = vrcp.f32 %v1643_v11 }
 0x77c   :  { %v2921_v19 = vpop.eup %2920 }
 0x77d   :  { %v1647_v20 = vmul.f32 %v2921_v19, %v1646_v16  ;;  %v2923_v29 = vpop.eup %2922 }
 0x77e   :  { %v1652_v34 = vsub.f32 1.0, %v2923_v29  ;;  %v1654_v42 = vmul.f32 %v2923_v29, %v3513_v18 }
 0x77f   :  { %v1650_v28 = vadd.f32 %v1648_v25, %v1647_v20 }
 0x781   :  { %2924 = vtanh.f32 %v1650_v28 }
 0x78b   :  { %v2925_v38 = vpop.eup %2924 }
 0x78c   :  { %v1653_v39 = vmul.f32 %v2925_v38, %v1652_v34 }
 0x78e   :  { %v1655_v48 = vadd.f32 %v1654_v42, %v1653_v39 }
 0x790   :  { %1657 = vst [vmem:[#allocation9 + $0xc] sm:$0x3] %v1655_v48  ;;  %1723 = vmatmul.mubr.f32.vlgmr.msra.gmra.mrb[18].mxu0 %v1655_v48  ;;  %2330 = vmatmul.mubr.f32.vlgmr.msra.gmra.mrb[16].mxu1 %v1655_v48 }
 0x863   :  { %v1724_v49 = vpop.f32.mrb[18].mxu0  ;;  %v1795_v58 = vpop.f32.mrb[16].mxu1 }
 0x864   :  { %v1799_v22 = vadd.f32 %v1724_v49, %v3279_v60  ;;  %v1726_v59 = vpop.f32.mrb[19].mxu0  ;;  %v2331_v23 = vpop.f32.mrb[17].mxu1  ;;  %v1815_v36 = vadd.f32 %v3284_v15, %v1795_v58 }
 0x865   :  { %v1808_v43 = vadd.f32 %v1806_v21, %v1726_v59 }
 0x866   :  { %v1861_v33 = vmul.f32 -1.442695, %v1799_v22 }
 0x867   :  { %v1862_v24 = vmul.f32 -1.442695, %v1808_v43 }
 0x868   :  { %2926 = vpow2.f32 %v1861_v33 }
 0x869   :  { %2928 = vpow2.f32 %v1862_v24 }
 0x872   :  { %v2927_v26 = vpop.eup %2926 }
 0x873   :  { %v1803_v27 = vadd.f32 1.0, %v2927_v26  ;;  %v2929_v30 = vpop.eup %2928 }
 0x874   :  { %v1812_v31 = vadd.f32 1.0, %v2929_v30 }
 0x875   :  { %2930 = vrcp.f32 %v1803_v27 }
 0x876   :  { %2932 = vrcp.f32 %v1812_v31 }
 0x87f   :  { %v2931_v57 = vpop.eup %2930 }
 0x880   :  { %v1816_v52 = vmul.f32 %v2931_v57, %v1815_v36  ;;  %v2933_v40 = vpop.eup %2932 }
 0x881   :  { %v1821_v47 = vsub.f32 1.0, %v2933_v40  ;;  %v1823_v63 = vmul.f32 %v2933_v40, %v1655_v48 }
 0x882   :  { %v1819_v37 = vadd.f32 %v1817_v32, %v1816_v52 }
 0x884   :  { %2934 = vtanh.f32 %v1819_v37 }
 0x88e   :  { %v2935_v53 = vpop.eup %2934 }
 0x88f   :  { %v1822_v62 = vmul.f32 %v2935_v53, %v1821_v47 }
 0x891   :  { %v1824_v3 = vadd.f32 %v1823_v63, %v1822_v62 }
 0x893   :  { %1826 = vst [vmem:[#allocation9 + $0xe] sm:$0x3] %v1824_v3  ;;  %1827 = vst [vmem:[#allocation2] sm:$0x3] %v1824_v3 }
 0x894   :  { %3013 = shalt.err (!%p3010_p0)
}
 0x895   :  { %s3014_s12 = scalar_lea.hbm %s3580_s5, 256 }
 0x896   :  { %p3015_p1 = scmp.ne.s32.totalorder %s3580_s5, %s3014_s12  ;;  %p3018_p2 = scmp.lt.u32.totalorder %s3014_s12, %s3580_s5 }
 0x898   :  { %p3020_p3 = pnand %p3018_p2, %p3015_p1 }
 0x89a   :  { %3023 = shalt.err (!%p3020_p3)
}
 0x89b   :  { %1839 = dma.vmem_to_hbm [thread:$0]  %s1834_s8, 256, %s3580_s5, [#allocation5], %s3034_s1, %s3034_s1, %s3035_s17  }
 0x89c   :  { %3028 = dma.done.wait [#allocation5], 256  }
 0x89d   :  { %3029 = vsyncadd [#allocation5], 4294967040 }
 0x89e   :  { %1843 = vsyncpa [#allocation4], 1 }
 0x89f   :  { %1844 = vsyncpa [#allocation7], 1 }
 0x8a0   :  { %1845 = vsyncpa [#allocation5], 1 }

</bundles_post_ra>
